<compile_context>
chip_gen: v5e
topology: v5e:2x2
jax: 0.10.0
libtpu: 0.0.40
codegen_flags: <defaults>
</compile_context>

<pallas_src>
import functools

import jax
import jax.numpy as jnp
import numpy as np
from jax.experimental import pallas as pl
from jax.experimental.pallas import tpu as pltpu


def _silu(y):
    # x * sigmoid(x); same explicit formula in kernel and reference.
    return y * (1.0 / (1.0 + jnp.exp(-y)))


# ----------------------------------------------------------------------------
# Fused Pallas kernel: one grid step == one image (whole block stays in VMEM).
# ----------------------------------------------------------------------------
def _mbconv_kernel(x_ref, w1_ref, b1_ref, wdw_ref, dwm_ref, b2_ref,
                   w3_ref, b3_ref, o_ref, *, H, W, identity):
    HW = H * W
    xv = x_ref[...]                                     # (Cin, HW), input dtype

    # ---- stage 1: 1x1 expand conv (BN1 scale folded into w1) + bias + SiLU --
    h = jnp.dot(w1_ref[...], xv.astype(jnp.bfloat16),
                preferred_element_type=jnp.float32)     # (hidden, HW) f32
    h = _silu(h + b1_ref[...])

    # ---- stage 2: depthwise 3x3, stride 1, zero pad (BN2 folded) + SiLU -----
    # Spatial shift by (dy, dx) is a lane roll of the flattened H*W axis;
    # zero-padding is a precomputed per-tap boundary mask (1, HW) applied at
    # the destination position (center tap needs no mask).
    wdw = wdw_ref[...]                                  # (hidden, 9) f32
    dwm = dwm_ref[...]                                  # (9, HW)    f32 {0,1}
    acc = jnp.zeros_like(h)
    for dy in (-1, 0, 1):
        for dx in (-1, 0, 1):
            k = (dy + 1) * 3 + (dx + 1)
            off = dy * W + dx
            shifted = pltpu.roll(h, shift=(-off) % HW, axis=1) if off else h
            tap = shifted * wdw[:, k:k + 1]
            if dy != 0 or dx != 0:
                tap = tap * dwm[k:k + 1, :]
            acc = acc + tap
    d = _silu(acc + b2_ref[...])

    # ---- stage 3: 1x1 project conv (BN3 scale folded) + bias (+ residual) ---
    y = jnp.dot(w3_ref[...], d.astype(jnp.bfloat16),
                preferred_element_type=jnp.float32)     # (oup, HW) f32
    y = y + b3_ref[...]
    if identity:
        y = y + xv.astype(jnp.float32)
    o_ref[...] = y.astype(o_ref.dtype)


def _dw_boundary_masks(H, W):
    """(9, H*W) float masks: 1 where the shifted source pixel is in-bounds."""
    idx = np.arange(H * W)
    row, col = idx // W, idx % W
    masks = []
    for dy in (-1, 0, 1):
        for dx in (-1, 0, 1):
            ok = ((row + dy >= 0) & (row + dy < H) &
                  (col + dx >= 0) & (col + dx < W))
            masks.append(ok)
    return jnp.asarray(np.stack(masks).astype(np.float32))


def mbconv_forward(x_nchw, params, *, stride=1, use_se=True):
    assert use_se and stride == 1, "only use_se=True, stride=1 is implemented"
    N, Cin, H, W = x_nchw.shape
    HW = H * W
    hidden = params["w1f"].shape[0]
    oup = params["w3f"].shape[0]
    identity = (stride == 1) and (Cin == oup)

    x3 = x_nchw.reshape(N, Cin, HW)     # free reshape, keeps NCHW memory order
    dwm = _dw_boundary_masks(H, W)

    kernel = functools.partial(_mbconv_kernel, H=H, W=W, identity=identity)
    out = pl.pallas_call(
        kernel,
        out_shape=jax.ShapeDtypeStruct((N, oup, HW), x_nchw.dtype),
        grid=(N,),
        in_specs=[
            pl.BlockSpec((None, Cin, HW), lambda n: (n, 0, 0)),   # x
            pl.BlockSpec((hidden, Cin), lambda n: (0, 0)),        # w1 (bf16)
            pl.BlockSpec((hidden, 1), lambda n: (0, 0)),          # b1
            pl.BlockSpec((hidden, 9), lambda n: (0, 0)),          # dw weights
            pl.BlockSpec((9, HW), lambda n: (0, 0)),              # dw masks
            pl.BlockSpec((hidden, 1), lambda n: (0, 0)),          # b2
            pl.BlockSpec((oup, hidden), lambda n: (0, 0)),        # w3 (bf16)
            pl.BlockSpec((oup, 1), lambda n: (0, 0)),             # b3
        ],
        out_specs=pl.BlockSpec((None, oup, HW), lambda n: (n, 0, 0)),
        compiler_params=pltpu.CompilerParams(
            dimension_semantics=("parallel",)),
    )(x3, params["w1f"], params["b1"], params["wdwf"], dwm,
      params["b2"], params["w3f"], params["b3"])
    return out.reshape(N, oup, H, W)


# ----------------------------------------------------------------------------
# Parameters (deterministic synthetic, PyTorch-layout) and BN folding
# ----------------------------------------------------------------------------
def make_params(key, inp, oup, expand_ratio):
    hidden = int(round(inp * expand_ratio))
    ks = iter(jax.random.split(key, 16))

    def bn(c):
        return dict(
            gamma=1.0 + 0.1 * jax.random.normal(next(ks), (c,), jnp.float32),
            beta=0.1 * jax.random.normal(next(ks), (c,), jnp.float32),
            mean=0.1 * jax.random.normal(next(ks), (c,), jnp.float32),
            var=0.5 + jnp.abs(jax.random.normal(next(ks), (c,), jnp.float32)),
        )

    return dict(
        w1=0.1 * jax.random.normal(next(ks), (hidden, inp), jnp.float32),
        bn1=bn(hidden),
        wdw=0.1 * jax.random.normal(next(ks), (hidden, 9), jnp.float32),
        bn2=bn(hidden),
        w3=0.1 * jax.random.normal(next(ks), (oup, hidden), jnp.float32),
        bn3=bn(oup),
    )


def fold_params(raw, *, eps=1e-5, mxu_dtype=jnp.bfloat16):
    """Fold inference BatchNorm into conv weights; cast matmul weights to bf16."""
    def fold(p):
        s = p["gamma"] * jax.lax.rsqrt(p["var"] + eps)
        return s, p["beta"] - p["mean"] * s

    s1, b1 = fold(raw["bn1"])
    s2, b2 = fold(raw["bn2"])
    s3, b3 = fold(raw["bn3"])
    return dict(
        w1f=(raw["w1"] * s1[:, None]).astype(mxu_dtype),
        b1=b1[:, None].astype(jnp.float32),
        wdwf=(raw["wdw"] * s2[:, None]).astype(jnp.float32),
        b2=b2[:, None].astype(jnp.float32),
        w3f=(raw["w3"] * s3[:, None]).astype(mxu_dtype),
        b3=b3[:, None].astype(jnp.float32),
    )


# ----------------------------------------------------------------------------
# Pure-JAX f32 reference (unfolded BN) for verification
# ----------------------------------------------------------------------------
def reference_forward(x_nchw, raw, *, stride=1, eps=1e-5):
    N, Cin, H, W = x_nchw.shape
    hidden = raw["w1"].shape[0]
    oup = raw["w3"].shape[0]

    def bn(y, p):
        s = p["gamma"] * jax.lax.rsqrt(p["var"] + eps)
        b = p["beta"] - p["mean"] * s
        return y * s[None, :, None, None] + b[None, :, None, None]

    x = x_nchw.astype(jnp.float32)
    h = _silu(bn(jnp.einsum("oc,nchw->nohw", raw["w1"], x), raw["bn1"]))
    hp = jnp.pad(h, ((0, 0), (0, 0), (1, 1), (1, 1)))
    acc = jnp.zeros((N, hidden, H, W), jnp.float32)
    for dy in range(3):
        for dx in range(3):
            w = raw["wdw"][:, 3 * dy + dx][None, :, None, None]
            acc = acc + hp[:, :, dy:dy + H, dx:dx + W] * w
    d = _silu(bn(acc, raw["bn2"]))
    y = bn(jnp.einsum("oc,nchw->nohw", raw["w3"], d), raw["bn3"])
    if stride == 1 and Cin == oup:
        y = y + x
    return y


if __name__ == "__main__":
    key = jax.random.PRNGKey(0)
    kx, kp = jax.random.split(key)

    # MBConv(inp=16, oup=16, stride=1, expand_ratio=2, use_se=True)
    # -> hidden=32, identity residual active (full expand/dw/project path).
    inp, oup, stride, expand_ratio, use_se = 16, 16, 1, 2, True
    N, H, W = 2, 16, 16

    x = jax.random.normal(kx, (N, inp, H, W), jnp.float32)   # NCHW like PyTorch
    raw = make_params(kp, inp, oup, expand_ratio)
    params = fold_params(raw)

    out = mbconv_forward(x, params, stride=stride, use_se=use_se)
    out = jax.block_until_ready(out)
    assert out.shape == (N, oup, H, W)

    ref = reference_forward(x, raw, stride=stride)
    # Tolerance covers the bf16 MXU-operand cast (f32 accumulation) in the kernel.
    np.testing.assert_allclose(np.asarray(out), np.asarray(ref),
                               rtol=2e-2, atol=2e-2)

    print("KERNEL_OK")
</pallas_src>

<mosaic_0001>
module attributes {stable_mosaic.version = 11 : i64} {
  func.func @_mbconv_kernel(%arg0: i32, %arg1: memref<1x16x256xf32, #tpu.memory_space<vmem>>, %arg2: memref<32x16xbf16, #tpu.memory_space<vmem>>, %arg3: memref<32x1xf32, #tpu.memory_space<vmem>>, %arg4: memref<32x9xf32, #tpu.memory_space<vmem>>, %arg5: memref<9x256xf32, #tpu.memory_space<vmem>>, %arg6: memref<32x1xf32, #tpu.memory_space<vmem>>, %arg7: memref<16x32xbf16, #tpu.memory_space<vmem>>, %arg8: memref<16x1xf32, #tpu.memory_space<vmem>>, %arg9: memref<1x16x256xf32, #tpu.memory_space<vmem>>) attributes {dimension_semantics = [#tpu.dimension_semantics<parallel>], iteration_bounds = array<i64: 2>, scalar_prefetch = 0 : i64, scratch_operands = 0 : i64, tpu.core_type = #tpu.core_type<tc>, window_params = [{transform_indices = @transform_0, window_bounds = array<i64: 1, 16, 256>}, {pipeline_mode = #tpu.pipeline_mode<synchronous>, transform_indices = @transform_1, window_bounds = array<i64: 32, 16>}, {pipeline_mode = #tpu.pipeline_mode<synchronous>, transform_indices = @transform_2, window_bounds = array<i64: 32, 1>}, {pipeline_mode = #tpu.pipeline_mode<synchronous>, transform_indices = @transform_3, window_bounds = array<i64: 32, 9>}, {pipeline_mode = #tpu.pipeline_mode<synchronous>, transform_indices = @transform_4, window_bounds = array<i64: 9, 256>}, {pipeline_mode = #tpu.pipeline_mode<synchronous>, transform_indices = @transform_5, window_bounds = array<i64: 32, 1>}, {pipeline_mode = #tpu.pipeline_mode<synchronous>, transform_indices = @transform_6, window_bounds = array<i64: 16, 32>}, {pipeline_mode = #tpu.pipeline_mode<synchronous>, transform_indices = @transform_7, window_bounds = array<i64: 16, 1>}, {transform_indices = @transform_8, window_bounds = array<i64: 1, 16, 256>}]} {
    %c0 = arith.constant 0 : index
    %c0_0 = arith.constant 0 : index
    %c0_1 = arith.constant 0 : index
    %0 = vector.load %arg1[%c0, %c0_0, %c0_1] : memref<1x16x256xf32, #tpu.memory_space<vmem>>, vector<1x16x256xf32>
    %1 = vector.shape_cast %0 : vector<1x16x256xf32> to vector<16x256xf32>
    %c0_2 = arith.constant 0 : index
    %c0_3 = arith.constant 0 : index
    %2 = vector.load %arg2[%c0_2, %c0_3] : memref<32x16xbf16, #tpu.memory_space<vmem>>, vector<32x16xbf16>
    %3 = arith.truncf %1 : vector<16x256xf32> to vector<16x256xbf16>
    %cst = arith.constant dense<0.000000e+00> : vector<32x256xf32>
    %4 = tpu.matmul %2, %3, %cst {dimension_numbers = #tpu.dot_dimension_numbers<[1], [0], [0], [1], [0, 0, 1, 1], [], []>} : vector<32x16xbf16>, vector<16x256xbf16>, vector<32x256xf32> -> vector<32x256xf32>
    %c0_4 = arith.constant 0 : index
    %c0_5 = arith.constant 0 : index
    %5 = vector.load %arg3[%c0_4, %c0_5] : memref<32x1xf32, #tpu.memory_space<vmem>>, vector<32x1xf32>
    %6 = vector.broadcast %5 : vector<32x1xf32> to vector<32x256xf32>
    %7 = arith.addf %4, %6 : vector<32x256xf32>
    %cst_6 = arith.constant 0.000000e+00 : f32
    %8 = vector.broadcast %cst_6 : f32 to vector<32x256xf32>
    %9 = arith.subf %8, %7 : vector<32x256xf32>
    %10 = math.exp %9 : vector<32x256xf32>
    %cst_7 = arith.constant 1.000000e+00 : f32
    %11 = vector.broadcast %cst_7 : f32 to vector<32x256xf32>
    %12 = arith.addf %11, %10 : vector<32x256xf32>
    %cst_8 = arith.constant 1.000000e+00 : f32
    %13 = vector.broadcast %cst_8 : f32 to vector<32x256xf32>
    %14 = arith.divf %13, %12 : vector<32x256xf32>
    %15 = arith.mulf %7, %14 : vector<32x256xf32>
    %c0_9 = arith.constant 0 : index
    %c0_10 = arith.constant 0 : index
    %16 = vector.load %arg4[%c0_9, %c0_10] : memref<32x9xf32, #tpu.memory_space<vmem>>, vector<32x9xf32>
    %c0_11 = arith.constant 0 : index
    %c0_12 = arith.constant 0 : index
    %17 = vector.load %arg5[%c0_11, %c0_12] : memref<9x256xf32, #tpu.memory_space<vmem>>, vector<9x256xf32>
    %cst_13 = arith.constant 0.000000e+00 : f32
    %18 = vector.broadcast %cst_13 : f32 to vector<32x256xf32>
    %c17_i32 = arith.constant 17 : i32
    %19 = tpu.dynamic_rotate %15 by %c17_i32 dim 1 : vector<32x256xf32>, i32 -> vector<32x256xf32>
    %20 = vector.extract_strided_slice %16 {offsets = [0, 0], sizes = [32, 1], strides = [1, 1]} : vector<32x9xf32> to vector<32x1xf32>
    %21 = vector.broadcast %20 : vector<32x1xf32> to vector<32x256xf32>
    %22 = arith.mulf %19, %21 : vector<32x256xf32>
    %23 = vector.extract_strided_slice %17 {offsets = [0, 0], sizes = [1, 256], strides = [1, 1]} : vector<9x256xf32> to vector<1x256xf32>
    %24 = vector.broadcast %23 : vector<1x256xf32> to vector<32x256xf32>
    %25 = arith.mulf %22, %24 : vector<32x256xf32>
    %26 = arith.addf %18, %25 : vector<32x256xf32>
    %c16_i32 = arith.constant 16 : i32
    %27 = tpu.dynamic_rotate %15 by %c16_i32 dim 1 : vector<32x256xf32>, i32 -> vector<32x256xf32>
    %28 = vector.extract_strided_slice %16 {offsets = [0, 1], sizes = [32, 1], strides = [1, 1]} : vector<32x9xf32> to vector<32x1xf32>
    %29 = vector.broadcast %28 : vector<32x1xf32> to vector<32x256xf32>
    %30 = arith.mulf %27, %29 : vector<32x256xf32>
    %31 = vector.extract_strided_slice %17 {offsets = [1, 0], sizes = [1, 256], strides = [1, 1]} : vector<9x256xf32> to vector<1x256xf32>
    %32 = vector.broadcast %31 : vector<1x256xf32> to vector<32x256xf32>
    %33 = arith.mulf %30, %32 : vector<32x256xf32>
    %34 = arith.addf %26, %33 : vector<32x256xf32>
    %c15_i32 = arith.constant 15 : i32
    %35 = tpu.dynamic_rotate %15 by %c15_i32 dim 1 : vector<32x256xf32>, i32 -> vector<32x256xf32>
    %36 = vector.extract_strided_slice %16 {offsets = [0, 2], sizes = [32, 1], strides = [1, 1]} : vector<32x9xf32> to vector<32x1xf32>
    %37 = vector.broadcast %36 : vector<32x1xf32> to vector<32x256xf32>
    %38 = arith.mulf %35, %37 : vector<32x256xf32>
    %39 = vector.extract_strided_slice %17 {offsets = [2, 0], sizes = [1, 256], strides = [1, 1]} : vector<9x256xf32> to vector<1x256xf32>
    %40 = vector.broadcast %39 : vector<1x256xf32> to vector<32x256xf32>
    %41 = arith.mulf %38, %40 : vector<32x256xf32>
    %42 = arith.addf %34, %41 : vector<32x256xf32>
    %c1_i32 = arith.constant 1 : i32
    %43 = tpu.dynamic_rotate %15 by %c1_i32 dim 1 : vector<32x256xf32>, i32 -> vector<32x256xf32>
    %44 = vector.extract_strided_slice %16 {offsets = [0, 3], sizes = [32, 1], strides = [1, 1]} : vector<32x9xf32> to vector<32x1xf32>
    %45 = vector.broadcast %44 : vector<32x1xf32> to vector<32x256xf32>
    %46 = arith.mulf %43, %45 : vector<32x256xf32>
    %47 = vector.extract_strided_slice %17 {offsets = [3, 0], sizes = [1, 256], strides = [1, 1]} : vector<9x256xf32> to vector<1x256xf32>
    %48 = vector.broadcast %47 : vector<1x256xf32> to vector<32x256xf32>
    %49 = arith.mulf %46, %48 : vector<32x256xf32>
    %50 = arith.addf %42, %49 : vector<32x256xf32>
    %51 = vector.extract_strided_slice %16 {offsets = [0, 4], sizes = [32, 1], strides = [1, 1]} : vector<32x9xf32> to vector<32x1xf32>
    %52 = vector.broadcast %51 : vector<32x1xf32> to vector<32x256xf32>
    %53 = arith.mulf %15, %52 : vector<32x256xf32>
    %54 = arith.addf %50, %53 : vector<32x256xf32>
    %c255_i32 = arith.constant 255 : i32
    %55 = tpu.dynamic_rotate %15 by %c255_i32 dim 1 : vector<32x256xf32>, i32 -> vector<32x256xf32>
    %56 = vector.extract_strided_slice %16 {offsets = [0, 5], sizes = [32, 1], strides = [1, 1]} : vector<32x9xf32> to vector<32x1xf32>
    %57 = vector.broadcast %56 : vector<32x1xf32> to vector<32x256xf32>
    %58 = arith.mulf %55, %57 : vector<32x256xf32>
    %59 = vector.extract_strided_slice %17 {offsets = [5, 0], sizes = [1, 256], strides = [1, 1]} : vector<9x256xf32> to vector<1x256xf32>
    %60 = vector.broadcast %59 : vector<1x256xf32> to vector<32x256xf32>
    %61 = arith.mulf %58, %60 : vector<32x256xf32>
    %62 = arith.addf %54, %61 : vector<32x256xf32>
    %c241_i32 = arith.constant 241 : i32
    %63 = tpu.dynamic_rotate %15 by %c241_i32 dim 1 : vector<32x256xf32>, i32 -> vector<32x256xf32>
    %64 = vector.extract_strided_slice %16 {offsets = [0, 6], sizes = [32, 1], strides = [1, 1]} : vector<32x9xf32> to vector<32x1xf32>
    %65 = vector.broadcast %64 : vector<32x1xf32> to vector<32x256xf32>
    %66 = arith.mulf %63, %65 : vector<32x256xf32>
    %67 = vector.extract_strided_slice %17 {offsets = [6, 0], sizes = [1, 256], strides = [1, 1]} : vector<9x256xf32> to vector<1x256xf32>
    %68 = vector.broadcast %67 : vector<1x256xf32> to vector<32x256xf32>
    %69 = arith.mulf %66, %68 : vector<32x256xf32>
    %70 = arith.addf %62, %69 : vector<32x256xf32>
    %c240_i32 = arith.constant 240 : i32
    %71 = tpu.dynamic_rotate %15 by %c240_i32 dim 1 : vector<32x256xf32>, i32 -> vector<32x256xf32>
    %72 = vector.extract_strided_slice %16 {offsets = [0, 7], sizes = [32, 1], strides = [1, 1]} : vector<32x9xf32> to vector<32x1xf32>
    %73 = vector.broadcast %72 : vector<32x1xf32> to vector<32x256xf32>
    %74 = arith.mulf %71, %73 : vector<32x256xf32>
    %75 = vector.extract_strided_slice %17 {offsets = [7, 0], sizes = [1, 256], strides = [1, 1]} : vector<9x256xf32> to vector<1x256xf32>
    %76 = vector.broadcast %75 : vector<1x256xf32> to vector<32x256xf32>
    %77 = arith.mulf %74, %76 : vector<32x256xf32>
    %78 = arith.addf %70, %77 : vector<32x256xf32>
    %c239_i32 = arith.constant 239 : i32
    %79 = tpu.dynamic_rotate %15 by %c239_i32 dim 1 : vector<32x256xf32>, i32 -> vector<32x256xf32>
    %80 = vector.extract_strided_slice %16 {offsets = [0, 8], sizes = [32, 1], strides = [1, 1]} : vector<32x9xf32> to vector<32x1xf32>
    %81 = vector.broadcast %80 : vector<32x1xf32> to vector<32x256xf32>
    %82 = arith.mulf %79, %81 : vector<32x256xf32>
    %83 = vector.extract_strided_slice %17 {offsets = [8, 0], sizes = [1, 256], strides = [1, 1]} : vector<9x256xf32> to vector<1x256xf32>
    %84 = vector.broadcast %83 : vector<1x256xf32> to vector<32x256xf32>
    %85 = arith.mulf %82, %84 : vector<32x256xf32>
    %86 = arith.addf %78, %85 : vector<32x256xf32>
    %c0_14 = arith.constant 0 : index
    %c0_15 = arith.constant 0 : index
    %87 = vector.load %arg6[%c0_14, %c0_15] : memref<32x1xf32, #tpu.memory_space<vmem>>, vector<32x1xf32>
    %88 = vector.broadcast %87 : vector<32x1xf32> to vector<32x256xf32>
    %89 = arith.addf %86, %88 : vector<32x256xf32>
    %cst_16 = arith.constant 0.000000e+00 : f32
    %90 = vector.broadcast %cst_16 : f32 to vector<32x256xf32>
    %91 = arith.subf %90, %89 : vector<32x256xf32>
    %92 = math.exp %91 : vector<32x256xf32>
    %cst_17 = arith.constant 1.000000e+00 : f32
    %93 = vector.broadcast %cst_17 : f32 to vector<32x256xf32>
    %94 = arith.addf %93, %92 : vector<32x256xf32>
    %cst_18 = arith.constant 1.000000e+00 : f32
    %95 = vector.broadcast %cst_18 : f32 to vector<32x256xf32>
    %96 = arith.divf %95, %94 : vector<32x256xf32>
    %97 = arith.mulf %89, %96 : vector<32x256xf32>
    %c0_19 = arith.constant 0 : index
    %c0_20 = arith.constant 0 : index
    %98 = vector.load %arg7[%c0_19, %c0_20] : memref<16x32xbf16, #tpu.memory_space<vmem>>, vector<16x32xbf16>
    %99 = arith.truncf %97 : vector<32x256xf32> to vector<32x256xbf16>
    %cst_21 = arith.constant dense<0.000000e+00> : vector<16x256xf32>
    %100 = tpu.matmul %98, %99, %cst_21 {dimension_numbers = #tpu.dot_dimension_numbers<[1], [0], [0], [1], [0, 0, 1, 1], [], []>} : vector<16x32xbf16>, vector<32x256xbf16>, vector<16x256xf32> -> vector<16x256xf32>
    %c0_22 = arith.constant 0 : index
    %c0_23 = arith.constant 0 : index
    %101 = vector.load %arg8[%c0_22, %c0_23] : memref<16x1xf32, #tpu.memory_space<vmem>>, vector<16x1xf32>
    %102 = vector.broadcast %101 : vector<16x1xf32> to vector<16x256xf32>
    %103 = arith.addf %100, %102 : vector<16x256xf32>
    %104 = arith.addf %103, %1 : vector<16x256xf32>
    %c0_24 = arith.constant 0 : index
    %c0_25 = arith.constant 0 : index
    %c0_26 = arith.constant 0 : index
    %105 = vector.load %arg9[%c0_24, %c0_25, %c0_26] : memref<1x16x256xf32, #tpu.memory_space<vmem>>, vector<1x16x256xf32>
    %106 = vector.shape_cast %105 : vector<1x16x256xf32> to vector<16x256xf32>
    %107 = vector.shape_cast %104 : vector<16x256xf32> to vector<1x16x256xf32>
    tpu.vector_store %arg9[%c0_24, %c0_25, %c0_26], %107 {strides = array<i32>} : memref<1x16x256xf32, #tpu.memory_space<vmem>>, vector<1x16x256xf32>,
    return
  }
  func.func @transform_0(%arg0: i32) -> (i32, i32, i32) {
    %c0_i32 = arith.constant 0 : i32
    %c0_i32_0 = arith.constant 0 : i32
    %c0_i32_1 = arith.constant 0 : i32
    return %arg0, %c0_i32, %c0_i32_0 : i32, i32, i32
  }
  func.func @transform_1(%arg0: i32) -> (i32, i32) {
    %c0_i32 = arith.constant 0 : i32
    %c0_i32_0 = arith.constant 0 : i32
    %c0_i32_1 = arith.constant 0 : i32
    return %c0_i32, %c0_i32_0 : i32, i32
  }
  func.func @transform_2(%arg0: i32) -> (i32, i32) {
    %c0_i32 = arith.constant 0 : i32
    %c0_i32_0 = arith.constant 0 : i32
    %c0_i32_1 = arith.constant 0 : i32
    return %c0_i32, %c0_i32_0 : i32, i32
  }
  func.func @transform_3(%arg0: i32) -> (i32, i32) {
    %c0_i32 = arith.constant 0 : i32
    %c0_i32_0 = arith.constant 0 : i32
    %c0_i32_1 = arith.constant 0 : i32
    return %c0_i32, %c0_i32_0 : i32, i32
  }
  func.func @transform_4(%arg0: i32) -> (i32, i32) {
    %c0_i32 = arith.constant 0 : i32
    %c0_i32_0 = arith.constant 0 : i32
    %c0_i32_1 = arith.constant 0 : i32
    return %c0_i32, %c0_i32_0 : i32, i32
  }
  func.func @transform_5(%arg0: i32) -> (i32, i32) {
    %c0_i32 = arith.constant 0 : i32
    %c0_i32_0 = arith.constant 0 : i32
    %c0_i32_1 = arith.constant 0 : i32
    return %c0_i32, %c0_i32_0 : i32, i32
  }
  func.func @transform_6(%arg0: i32) -> (i32, i32) {
    %c0_i32 = arith.constant 0 : i32
    %c0_i32_0 = arith.constant 0 : i32
    %c0_i32_1 = arith.constant 0 : i32
    return %c0_i32, %c0_i32_0 : i32, i32
  }
  func.func @transform_7(%arg0: i32) -> (i32, i32) {
    %c0_i32 = arith.constant 0 : i32
    %c0_i32_0 = arith.constant 0 : i32
    %c0_i32_1 = arith.constant 0 : i32
    return %c0_i32, %c0_i32_0 : i32, i32
  }
  func.func @transform_8(%arg0: i32) -> (i32, i32, i32) {
    %c0_i32 = arith.constant 0 : i32
    %c0_i32_0 = arith.constant 0 : i32
    %c0_i32_1 = arith.constant 0 : i32
    return %arg0, %c0_i32, %c0_i32_0 : i32, i32, i32
  }
}

</mosaic_0001>

<bundles_post_ra>
// kernel: tpu_custom_call.1
= control target key start
LH: loop header
LB: loop body
LE: loop exit
PB: predicated region body
PF: predicated region fallthrough
CT: control target
= control target key end

     0   :  { %13 = vsyncpa [#allocation3], 0  ;;  %s2798_s0 = inlined_call_operand.vmem [shape: f32[2,16,256], index: 0, kind: input, shape index: {}]   ;;  %s2799_s1 = inlined_call_operand.vmem [shape: bf16[32,16], index: 1, kind: input, shape index: {}]   ;;  %s2800_s2 = inlined_call_operand.vmem [shape: f32[32,1], index: 2, kind: input, shape index: {}]   ;;  %s2801_s3 = inlined_call_operand.vmem [shape: f32[32,9], index: 3, kind: input, shape index: {}]   ;;  %s2802_s4 = inlined_call_operand.vmem [shape: f32[9,256], index: 4, kind: input, shape index: {}]   ;;  %s2803_s5 = inlined_call_operand.vmem [shape: f32[32,1], index: 5, kind: input, shape index: {}]   ;;  %s2804_s6 = inlined_call_operand.vmem [shape: bf16[16,32], index: 6, kind: input, shape index: {}]   ;;  %s2805_s7 = inlined_call_operand.vmem [shape: f32[16,1], index: 7, kind: input, shape index: {}]   ;;  %s2806_s8 = inlined_call_operand.hbm [shape: f32[2,16,256], index: 8, kind: output, shape index: {}]  }
   0x1   :  { %15 = vsyncpa [#allocation3 + $0x1], 0  ;;  %s1791_s27 = smov 0   ;;  %s1793_s28 = smov 0  }
   0x2   :  { %s1795_s29 = smov 0   ;;  %s1797_s30 = smov 0  }
   0x3 LB: > { %s1812_s9 = sadd.s32 4294967295, %s1726_s30   ;;  %s1469_s10 = sadd.s32 4294967294, %s1726_s30   ;;  %s1726_s30 = sphi %s1797_s30, %s2837_s30   ;;  %s1722_s29 = sphi %s1795_s29, %s2836_s29   ;;  %s1718_s28 = sphi %s1793_s28, %s2835_s28   ;;  %s1714_s27 = sphi %s1791_s27, %s2834_s27  }
   0x4   : > { %s1816_s11 = sadd.s32 1, %s1726_s30   ;;  %s201_s12 = sadd.s32 1, %s1722_s29 }
   0x5   : > { %s198_s13 = ssub.s32 %s1726_s30, %s1816_s11  ;;  %p211_p0 = scmp.ne.s32.totalorder %s1722_s29, %s1718_s28 }
   0x6   : > { %p199_p1 = scmp.eq.s32.totalorder %s198_s13, 0  ;;  %p212_p2 = scmp.eq.s32.totalorder %s1812_s9, 1 }
   0x7   : > { %p217_p3 = scmp.ne.s32.totalorder %s1718_s28, %s1714_s27  ;;  %p218_p4 = scmp.eq.s32.totalorder %s1469_s10, 1 }
   0x8   : > { %s1827_s14 = scalar_select %p199_p1, %s1722_s29, %s201_s12  }
   0x9   : > { %p1829_p5 = por %p212_p2, %p211_p0  ;;  %p1833_p6 = por %p218_p4, %p217_p3 }
   0xa   : > { %p1472_p7 = scmp.ge.s32.totalorder %s1726_s30, 1  ;;  %p265_p8 = scmp.lt.s32.totalorder %s1726_s30, 3 }
   0xc   : > { %p266_p9 = pnand %p1472_p7, %p265_p8 }
   0xd   : > { %p299_p10 = scmp.lt.s32.totalorder (!%p266_p9), %s1812_s9, 1  ;;  %s1735_s17 = smov (!%p266_p9), 16  }
   0xe   : > { %269 = sbr.rel (%p266_p9) target bundleno = 709 (0x2c5), region = 52  ;;  %s1736_s18 = smov (!%p266_p9), 17  }
   0xf   : > { %s1737_s19 = smov (!%p266_p9), 15   ;;  %s1738_s20 = smov (!%p266_p9), 1  }
  0x10   : > { %s1742_s23 = smov (!%p266_p9), 112   ;;  %s1744_s13 = smov (!%p266_p9), 111  }
  0x13   : > { %v317_v0 = vld [vmem:[%s2800_s2 + $0x10] sm:$0xff]  ;;  %v315_v1 = vld [vmem:[%s2800_s2] sm:$0xff]  ;;  %v2807_v2 = vmov 0   ;;  %s300_s21 = scalar_select %p299_p10, %s1812_s9, 1  ;;  %v318_v8 = vld [vmem:[%s2800_s2 + $0x18] sm:$0xff]  ;;  %vm349_vm0 = vcmask 130048  }
  0x14   : > { %1562 = vset.pattern.permute.xlu1 %v2807_v2  ;;  %1561 = vset.pattern.permute.xlu0 %v2807_v2  ;;  %v316_v10 = vld [vmem:[%s2800_s2 + $0x8] sm:$0xff]  ;;  %v1500_v11 = vld [vmem:[%s2799_s1] sm:$0xff]  ;;  %v1872_v12 = vld [vmem:[%s2801_s3 + $0x10] sm:$0xff]  ;;  %v1729_v15 = vmov 1   ;;  %v1730_v18 = vmov 2   ;;  %v1731_v19 = vmov 3  }
  0x15   : > { %331 = vperm.xlu1 %1562, %v317_v0   ;;  %321 = vperm.xlu0 %1561, %v315_v1   ;;  %s1499_s22 = sshll.u32 %s300_s21, 5  ;;  %v1879_v13 = vld [vmem:[%s2801_s3 + $0x8] sm:$0xff]  ;;  %v1884_v14 = vld [vmem:[%s2801_s3] sm:$0xff]  ;;  %v1892_v16 = vld [vmem:[%s2801_s3 + $0x18] sm:$0xff]  ;;  %v1732_v20 = vmov 4   ;;  %v1733_v21 = vmov 5  }
  0x16   : > { %1563 = vset.pattern.permute.xlu2 %v2807_v2  ;;  %s1853_s25 = scalar_lea.vmem %s2798_s0, %s1499_s22  ;;  %v1501_v17 = vld [vmem:[%s2799_s1 + $0x8] sm:$0xff]  ;;  %v2811_v24 = vmov 6   ;;  %s1739_s21 = smov 127  }
  0x17   : > { %v305_v3 = vld [vmem:[%s1853_s25] sm:$0xff]  ;;  %v307_v4 = vld [vmem:[%s1853_s25 + $0x10] sm:$0xff]  ;;  %v306_v5 = vld [vmem:[%s1853_s25 + $0x8] sm:$0xff]  ;;  %601 = vperm.xlu2 %1563, %v1872_v12   ;;  %s1741_s22 = smov 113  }
  0x18   : > { %v313_v6 = vpack.c.bf16 %v307_v4, %v305_v3  ;;  %v308_v7 = vld [vmem:[%s1853_s25 + $0x18] sm:$0xff] }
  0x19   : > { %v314_v9 = vpack.c.bf16 %v308_v7, %v306_v5 }
  0x1a   : > { %363 = vmatpush.bf16.msra.mxu0 %v313_v6 }
  0x1b   : > { %382 = vmatpush.bf16.msra.mxu1 %v314_v9 }
  0x1d   : > { %336 = vperm.xlu1 %1562, %v318_v8   ;;  %326 = vperm.xlu0 %1561, %v316_v10  }
  0x1e   : > { %1484 = vmatmul.msk.bf16.vlgmr.msra.gmra.mxu0 %vm349_vm0, %v1500_v11  ;;  %1486 = vmatmul.msk.bf16.vlgmr.msra.gmra.mxu1 %vm349_vm0, %v1500_v11 }
  0x1f   : > { %1566 = vset.pattern.permute.xlu2 %v1729_v15 }
  0x20   : > { %669 = vperm.xlu2 %1566, %v1872_v12  }
  0x25   : > { %596 = vperm.xlu1 %1562, %v1879_v13   ;;  %591 = vperm.xlu0 %1561, %v1884_v14  }
  0x28   : > { %1568 = vset.pattern.permute.xlu2 %v1730_v18 }
  0x29   : > { %732 = vperm.xlu2 %1568, %v1879_v13  }
  0x2d   : > { %1565 = vset.pattern.permute.xlu1 %v1729_v15  ;;  %606 = vperm.xlu0 %1561, %v1892_v16  }
  0x2e   : > { %665 = vperm.xlu1 %1565, %v1879_v13   ;;  %1485 = vmatmul.msk.bf16.gmra.mxu0 %vm349_vm0, %v1501_v17 }
  0x2f   : > { %1487 = vmatmul.msk.bf16.gmra.mxu1 %vm349_vm0, %v1501_v17 }
  0x31   : > { %1570 = vset.pattern.permute.xlu2 %v1731_v19 }
  0x32   : > { %795 = vperm.xlu2 %1570, %v1884_v14  }
  0x35   : > { %1564 = vset.pattern.permute.xlu0 %v1729_v15 }
  0x36   : > { %673 = vperm.xlu1 %1565, %v1892_v16   ;;  %661 = vperm.xlu0 %1564, %v1884_v14  }
  0x3a   : > { %807 = vperm.xlu2 %1570, %v1892_v16  }
  0x3e   : > { %1567 = vset.pattern.permute.xlu1 %v1730_v18  ;;  %1569 = vset.pattern.permute.xlu0 %v1730_v18 }
  0x3f   : > { %728 = vperm.xlu1 %1567, %v1884_v14   ;;  %736 = vperm.xlu0 %1569, %v1872_v12  }
  0x42   : > { %1574 = vset.pattern.permute.xlu2 %v1732_v20 }
  0x43   : > { %841 = vperm.xlu2 %1574, %v1879_v13  }
  0x47   : > { %740 = vperm.xlu1 %1567, %v1892_v16   ;;  %1571 = vset.pattern.permute.xlu0 %v1731_v19 }
  0x48   : > { %799 = vperm.xlu0 %1571, %v1879_v13  }
  0x4b   : > { %849 = vperm.xlu2 %1574, %v1892_v16  }
  0x4f   : > { %1572 = vset.pattern.permute.xlu1 %v1731_v19 }
  0x50   : > { %803 = vperm.xlu1 %1572, %v1872_v12   ;;  %1575 = vset.pattern.permute.xlu0 %v1733_v21 }
  0x51   : > { %902 = vperm.xlu0 %1575, %v1872_v12  }
  0x53   : > { %1578 = vset.pattern.permute.xlu2 %v2811_v24 }
  0x54   : > { %973 = vperm.xlu2 %1578, %v1892_v16  }
  0x58   : > { %1573 = vset.pattern.permute.xlu1 %v1732_v20 }
  0x59   : > { %837 = vperm.xlu1 %1573, %v1884_v14  }
  0x5c   : > { %1579 = vset.pattern.permute.xlu2 %v1733_v21 }
  0x61   : > { %845 = vperm.xlu1 %1573, %v1872_v12  }
  0x69   : > { %1576 = vset.pattern.permute.xlu1 %v1733_v21 }
  0x6a   : > { %906 = vperm.xlu1 %1576, %v1892_v16  }
  0x72   : > { %1577 = vset.pattern.permute.xlu1 %v2811_v24 }
  0x73   : > { %969 = vperm.xlu1 %1577, %v1872_v12  }
  0x87   : > { %v322_v22 = vpop.permute.xlu0 %321  ;;  %v332_v46 = vpop.permute.xlu1 %331 }
  0x8f   : > { %v327_v32 = vpop.permute.xlu0 %326 }
  0x9b   : > { %v365_v23 = vpop.f32.mrf.mxu0  ;;  %v384_v26 = vpop.f32.mrf.mxu1 }
  0x9c   : > { %v1919_v25 = vadd.f32 %v365_v23, %v322_v22  ;;  %v1923_v27 = vadd.f32 %v384_v26, %v322_v22 }
  0x9e   : > { %v394_v28 = vsub.f32 0.0, %v1919_v25  ;;  %v395_v29 = vsub.f32 0.0, %v1923_v27 }
  0xa0   : > { %v402_v30 = vmul.f32 1.442695, %v394_v28  ;;  %v404_v31 = vmul.f32 1.442695, %v395_v29 }
  0xa2   : > { %1594 = vpow2.f32 %v402_v30 }
  0xa3   : > { %1596 = vpow2.f32 %v404_v31  ;;  %v367_v33 = vpop.f32.mrf.mxu0  ;;  %v386_v35 = vpop.f32.mrf.mxu1 }
  0xa4   : > { %v1927_v34 = vadd.f32 %v367_v33, %v327_v32  ;;  %v1929_v36 = vadd.f32 %v386_v35, %v327_v32  ;;  %v337_v35 = vpop.permute.xlu1 %336 }
  0xa6   : > { %v396_v37 = vsub.f32 0.0, %v1927_v34  ;;  %v397_v38 = vsub.f32 0.0, %v1929_v36 }
  0xa8   : > { %v1595_v39 = vpop.eup %1594  ;;  %v406_v40 = vmul.f32 1.442695, %v396_v37  ;;  %v408_v43 = vmul.f32 1.442695, %v397_v38 }
  0xa9   : > { %v1597_v41 = vpop.eup %1596  ;;  %v418_v42 = vadd.f32 1.0, %v1595_v39 }
  0xaa   : > { %v419_v44 = vadd.f32 1.0, %v1597_v41  ;;  %1598 = vpow2.f32 %v406_v40 }
  0xab   : > { %1600 = vrcp.f32 %v418_v42  ;;  %v370_v45 = vpop.f32.mrf.mxu0  ;;  %v435_v60 = vand.u32 2147483647, %v418_v42  ;;  %v437_v63 = vand.u32 2147483648, %v418_v42  ;;  %vm431_vm3 = vweird.f32 %v418_v42 }
  0xac   : > { %1602 = vrcp.f32 %v419_v44  ;;  %v389_v47 = vpop.f32.mrf.mxu1  ;;  %v1933_v48 = vadd.f32 %v370_v45, %v332_v46  ;;  %v452_v4 = vand.u32 2147483648, %v419_v44  ;;  %v450_v6 = vand.u32 2147483647, %v419_v44 }
  0xad   : > { %1604 = vpow2.f32 %v408_v43  ;;  %v1935_v49 = vadd.f32 %v389_v47, %v332_v46  ;;  %v438_v8 = vor.u32 1.1754944e-38, %v437_v63  ;;  %vm446_vm5 = vweird.f32 %v419_v44 }
  0xae   : > { %v398_v54 = vsub.f32 0.0, %v1933_v48  ;;  %vm436_vm6 = vcmp.eq.f32.partialorder %v435_v60, 8.507059e+37  ;;  %v453_v11 = vor.u32 1.1754944e-38, %v452_v4  ;;  %vm451_vm8 = vcmp.eq.f32.partialorder %v450_v6, 8.507059e+37 }
  0xaf   : > { %v399_v51 = vsub.f32 0.0, %v1935_v49 }
  0xb0   : > { %v1599_v50 = vpop.eup %1598  ;;  %v410_v1 = vmul.f32 1.442695, %v398_v54  ;;  %v1984_v54 = vpop.permute.xlu2 %601 }
  0xb1   : > { %v1601_v52 = vpop.eup %1600  ;;  %v1938_v53 = vadd.f32 1.0, %v1599_v50  ;;  %v412_v62 = vmul.f32 1.442695, %v399_v51 }
  0xb2   : > { %v1603_v55 = vpop.eup %1602  ;;  %v427_v56 = vmul.f32 %v1601_v52, %v418_v42  ;;  %vm432_vm1 = vweird.f32 %v1601_v52 }
  0xb3   : > { %v1605_v57 = vpop.eup %1604  ;;  %v442_v58 = vmul.f32 %v1603_v55, %v419_v44  ;;  %1606 = vrcp.f32 %v1938_v53  ;;  %vm447_vm2 = vweird.f32 %v1603_v55  ;;  %vm433_vm4 = vmor %vm431_vm3, %vm432_vm1  ;;  %v372_v31 = vpop.f32.mrf.mxu0  ;;  %v467_v51 = vand.u32 2147483648, %v1938_v53 }
  0xb4   : > { %v428_v59 = vsub.f32 1.0, %v427_v56  ;;  %v1941_v61 = vadd.f32 1.0, %v1605_v57  ;;  %vm448_vm7 = vmor %vm446_vm5, %vm447_vm2  ;;  %v1969_v40 = vadd.f32 %v372_v31, %v337_v35  ;;  %v391_v47 = vpop.f32.mrf.mxu1  ;;  %vm461_vm14 = vweird.f32 %v1938_v53 }
  0xb5   : > { %v443_v0 = vsub.f32 1.0, %v442_v58  ;;  %v1991_v58 = vadd.f32 %v391_v47, %v337_v35 }
  0xb6   : > { %v429_v3 = vmul.f32 %v1601_v52, %v428_v59  ;;  %1608 = vrcp.f32 %v1941_v61  ;;  %v482_v38 = vand.u32 2147483648, %v1941_v61  ;;  %vm476_vm10 = vweird.f32 %v1941_v61  ;;  %v1993_v59 = vpop.permute.xlu1 %596 }
  0xb7   : > { %v444_v5 = vmul.f32 %v1603_v55, %v443_v0  ;;  %1610 = vpow2.f32 %v412_v62  ;;  %v480_v39 = vand.u32 2147483647, %v1941_v61  ;;  %v400_v44 = vsub.f32 0.0, %v1969_v40 }
  0xb8   : > { %v430_v7 = vadd.f32 %v1601_v52, %v429_v3  ;;  %1612 = vpow2.f32 %v410_v1  ;;  %v483_v43 = vor.u32 1.1754944e-38, %v482_v38  ;;  %v401_v63 = vsub.f32 0.0, %v1991_v58  ;;  %v2008_v6 = vpop.permute.xlu2 %669 }
  0xb9   : > { %v445_v9 = vadd.f32 %v1603_v55, %v444_v5  ;;  %v1945_v15 = vpop.eup %1606  ;;  %vm481_vm12 = vcmp.eq.f32.partialorder %v480_v39, 8.507059e+37  ;;  %v414_v57 = vmul.f32 1.442695, %v400_v44 }
  0xba   : > { %v434_v10 = vsel %vm433_vm4, %v1601_v52, %v430_v7  ;;  %v457_v28 = vmul.f32 %v1945_v15, %v1938_v53  ;;  %vm462_vm13 = vweird.f32 %v1945_v15  ;;  %v416_v4 = vmul.f32 1.442695, %v401_v63 }
  0xbb   : > { %v439_v17 = vsel %vm436_vm6, %v438_v8, %v434_v10  ;;  %v449_v18 = vsel %vm448_vm7, %v1603_v55, %v445_v9  ;;  %v465_v55 = vand.u32 2147483647, %v1938_v53  ;;  %vm463_vm15 = vmor %vm461_vm14, %vm462_vm13  ;;  %v468_v53 = vor.u32 1.1754944e-38, %v467_v51 }
  0xbc   : > { %v1609_v19 = vpop.eup %1608  ;;  %v1948_v20 = vmul.f32 %v439_v17, %v1919_v25  ;;  %v454_v21 = vsel %vm451_vm8, %v453_v11, %v449_v18  ;;  %v458_v32 = vsub.f32 1.0, %v457_v28 }
  0xbd   : > { %v1951_v22 = vmul.f32 %v454_v21, %v1923_v27  ;;  %v472_v23 = vmul.f32 %v1609_v19, %v1941_v61  ;;  %v1611_v26 = vpop.eup %1610  ;;  %vm477_vm9 = vweird.f32 %v1609_v19  ;;  %vm466_vm0 = vcmp.eq.f32.partialorder %v465_v55, 8.507059e+37 }
  0xbe   : > { %635 = vrot.lane.b32.xlu1 %v1948_v20, %s1735_s17  ;;  %562 = vrot.lane.b32.xlu2 %v1948_v20, %s1736_s18  ;;  %v1613_v25 = vpop.eup %1612  ;;  %v1962_v30 = vadd.f32 1.0, %v1611_v26  ;;  %vm478_vm11 = vmor %vm476_vm10, %vm477_vm9  ;;  %v459_v41 = vmul.f32 %v1945_v15, %v458_v32  ;;  %v2016_v9 = vpop.permute.xlu1 %665 }
  0xbf   : > { %v473_v29 = vsub.f32 1.0, %v472_v23  ;;  %710 = vrot.lane.b32.xlu0 %v1951_v22, %s1737_s19  ;;  %v1964_v33 = vadd.f32 1.0, %v1613_v25 }
  0xc0   : > { %1614 = vrcp.f32 %v1962_v30  ;;  %v460_v46 = vadd.f32 %v1945_v15, %v459_v41  ;;  %vm506_vm2 = vweird.f32 %v1962_v30  ;;  %v510_v17 = vand.u32 2147483647, %v1962_v30 }
  0xc1   : > { %v474_v27 = vmul.f32 %v1609_v19, %v473_v29  ;;  %1616 = vrcp.f32 %v1964_v33  ;;  %vm491_vm1 = vweird.f32 %v1964_v33  ;;  %v497_v11 = vand.u32 2147483648, %v1964_v33 }
  0xc2   : > { %v464_v60 = vsel %vm463_vm15, %v1945_v15, %v460_v46  ;;  %1618 = vpow2.f32 %v414_v57  ;;  %vm511_vm7 = vcmp.eq.f32.partialorder %v510_v17, 8.507059e+37 }
  0xc3   : > { %v475_v37 = vadd.f32 %v1609_v19, %v474_v27  ;;  %v469_v62 = vsel %vm466_vm0, %v468_v53, %v464_v60  ;;  %1620 = vpow2.f32 %v416_v4  ;;  %v498_v26 = vor.u32 1.1754944e-38, %v497_v11  ;;  %v2036_v27 = vpop.permute.xlu2 %732  ;;  %v2070_v60 = vpop.permute.xlu0 %591 }
  0xc4   : > { %v2006_v3 = vmul.f32 %v469_v62, %v1927_v34  ;;  %v512_v34 = vand.u32 2147483648, %v1962_v30 }
  0xc5   : > { %v479_v42 = vsel %vm478_vm11, %v1609_v19, %v475_v37  ;;  %v495_v19 = vand.u32 2147483647, %v1964_v33 }
  0xc6   : > { %777 = vrot.lane.b32.xlu1 %v1951_v22, %s1738_s20  ;;  %570 = vrot.lane.b32.xlu2 %v1951_v22, %s1736_s18  ;;  %v484_v45 = vsel %vm481_vm12, %v483_v43, %v479_v42  ;;  %v1615_v50 = vpop.eup %1614  ;;  %v513_v23 = vor.u32 1.1754944e-38, %v512_v34  ;;  %v2038_v31 = vpop.permute.xlu1 %673 }
  0xc7   : > { %868 = vrot.lane.b32.xlu0 %v1948_v20, %s1739_s21  ;;  %v1617_v52 = vpop.eup %1616  ;;  %v1989_v56 = vmul.f32 %v484_v45, %v1929_v36  ;;  %v502_v61 = vmul.f32 %v1615_v50, %v1962_v30  ;;  %vm507_vm3 = vweird.f32 %v1615_v50  ;;  %vm496_vm8 = vcmp.eq.f32.partialorder %v495_v19, 8.507059e+37 }
  0xc8   : > { %v487_v36 = vmul.f32 %v1617_v52, %v1964_v33  ;;  %v1619_v5 = vpop.eup %1618  ;;  %vm492_vm4 = vweird.f32 %v1617_v52  ;;  %vm508_vm5 = vmor %vm506_vm2, %vm507_vm3  ;;  %v578_v19 = vlaneseq }
  0xc9   : > { %v503_v0 = vsub.f32 1.0, %v502_v61  ;;  %v424_v10 = vadd.f32 1.0, %v1619_v5  ;;  %vm2024_vm6 = vmor %vm491_vm1, %vm492_vm4  ;;  %v1621_v25 = vpop.eup %1620 }
  0xca   : > { %v488_v1 = vsub.f32 1.0, %v487_v36  ;;  %v425_v33 = vadd.f32 1.0, %v1621_v25 }
  0xcb   : > { %v504_v7 = vmul.f32 %v1615_v50, %v503_v0  ;;  %1622 = vrcp.f32 %v424_v10  ;;  %v2052_v42 = vpop.permute.xlu2 %795  ;;  %vm521_vm9 = vweird.f32 %v424_v10  ;;  %v527_v45 = vand.u32 2147483648, %v424_v10 }
  0xcc   : > { %v489_v8 = vmul.f32 %v1617_v52, %v488_v1  ;;  %1624 = vrcp.f32 %v425_v33  ;;  %v525_v47 = vand.u32 2147483647, %v424_v10  ;;  %vm536_vm13 = vweird.f32 %v425_v33 }
  0xcd   : > { %v505_v15 = vadd.f32 %v1615_v50, %v504_v7  ;;  %v542_v36 = vand.u32 2147483648, %v425_v33  ;;  %v540_v63 = vand.u32 2147483647, %v425_v33 }
  0xce   : > { %712 = vrot.lane.b32.xlu1 %v1989_v56, %s1737_s19  ;;  %643 = vrot.lane.b32.xlu2 %v1951_v22, %s1735_s17  ;;  %v490_v18 = vadd.f32 %v1617_v52, %v489_v8  ;;  %vm526_vm12 = vcmp.eq.f32.partialorder %v525_v47, 8.507059e+37  ;;  %v2087_v8 = vpop.permute.xlu0 %606 }
  0xcf   : > { %572 = vrot.lane.b32.xlu0 %v1989_v56, %s1736_s18  ;;  %v509_v28 = vsel %vm508_vm5, %v1615_v50, %v505_v15  ;;  %v543_v1 = vor.u32 1.1754944e-38, %v542_v36  ;;  %vm541_vm0 = vcmp.eq.f32.partialorder %v540_v63, 8.507059e+37 }
  0xd0   : > { %v494_v29 = vsel %vm2024_vm6, %v1617_v52, %v490_v18  ;;  %v514_v30 = vsel %vm511_vm7, %v513_v23, %v509_v28  ;;  %v528_v52 = vor.u32 1.1754944e-38, %v527_v45  ;;  %v2812_v23 = vmov 7  }
  0xd1   : > { %v499_v32 = vsel %vm496_vm8, %v498_v26, %v494_v29  ;;  %v1623_v35 = vpop.eup %1622  ;;  %v2041_v37 = vmul.f32 %v514_v30, %v1935_v49  ;;  %v2054_v49 = vpop.permute.xlu1 %728  ;;  %1580 = vset.pattern.permute.xlu1 %v2812_v23  ;;  %v2121_v26 = vand.u32 127, %v578_v19 }
  0xd2   : > { %v2044_v38 = vmul.f32 %v499_v32, %v1933_v48  ;;  %v517_v39 = vmul.f32 %v1623_v35, %v424_v10  ;;  %v1625_v43 = vpop.eup %1624  ;;  %vm522_vm10 = vweird.f32 %v1623_v35 }
  0xd3   : > { %v532_v48 = vmul.f32 %v1625_v43, %v425_v33  ;;  %vm523_vm11 = vmor %vm521_vm9, %vm522_vm10  ;;  %v2062_v51 = vpop.permute.xlu2 %807  ;;  %vm537_vm14 = vweird.f32 %v1625_v43  ;;  %vm580_vm1 = vcmp.lt.s32.totalorder %v2121_v26, 17  ;;  %vm651_vm2 = vcmp.lt.s32.totalorder %v2121_v26, 16 }
  0xd4   : > { %v518_v41 = vsub.f32 1.0, %v517_v39  ;;  %vm538_vm15 = vmor %vm536_vm13, %vm537_vm14  ;;  %vm718_vm3 = vcmp.lt.s32.totalorder %v2121_v26, 15  ;;  %vm785_vm4 = vcmp.lt.s32.totalorder %v2121_v26, 1  ;;  %vm884_vm5 = vcmp.lt.s32.totalorder %v2121_v26, 127 }
  0xd5   : > { %v533_v50 = vsub.f32 1.0, %v532_v48  ;;  %vm951_vm6 = vcmp.lt.s32.totalorder %v2121_v26, 113  ;;  %vm1018_vm7 = vcmp.lt.s32.totalorder %v2121_v26, 112  ;;  %vm1085_vm8 = vcmp.lt.s32.totalorder %v2121_v26, 111 }
  0xd6   : > { %771 = vrot.lane.b32.xlu1 %v2006_v3, %s1738_s20  ;;  %702 = vrot.lane.b32.xlu2 %v1948_v20, %s1737_s19  ;;  %v519_v44 = vmul.f32 %v1623_v35, %v518_v41  ;;  %v662_v11 = vpop.permute.xlu0 %661  ;;  %v2151_v41 = vld [vmem:[%s2802_s4] sm:$0xff] }
  0xd7   : > { %645 = vrot.lane.b32.xlu0 %v1989_v56, %s1735_s17  ;;  %v534_v61 = vmul.f32 %v1625_v43, %v533_v50  ;;  %v2175_v47 = vperm.slane %v2151_v41, 1 }
  0xd8   : > { %v520_v46 = vadd.f32 %v1623_v35, %v519_v44  ;;  %v2164_v44 = vperm.slane %v2151_v41, 0 }
  0xd9   : > { %v2064_v57 = vpop.permute.xlu1 %740  ;;  %v535_v62 = vadd.f32 %v1625_v43, %v534_v61 }
  0xda   : > { %v524_v55 = vsel %vm523_vm11, %v1623_v35, %v520_v46 }
  0xdb   : > { %v529_v53 = vsel %vm526_vm12, %v528_v52, %v524_v55  ;;  %v2077_v4 = vpop.permute.xlu2 %841  ;;  %v539_v5 = vsel %vm538_vm15, %v1625_v43, %v535_v62  ;;  %v2156_v43 = vld [vmem:[%s2802_s4 + $0x8] sm:$0xff]  ;;  %v2185_v62 = vperm.slane %v2151_v41, 2 }
  0xdc   : > { %v2075_v0 = vmul.f32 %v529_v53, %v1969_v40  ;;  %v544_v40 = vsel %vm541_vm0, %v543_v1, %v539_v5  ;;  %v2167_v48 = vperm.slane %v2156_v43, 0  ;;  %v2178_v50 = vperm.slane %v2156_v43, 1 }
  0xdd   : > { %v2090_v34 = vmul.f32 %v544_v40, %v1991_v58 }
  0xde   : > { %870 = vrot.lane.b32.xlu1 %v2006_v3, %s1739_s21  ;;  %769 = vrot.lane.b32.xlu2 %v1948_v20, %s1738_s20  ;;  %v2110_v17 = vpop.permute.xlu0 %736 }
  0xdf   : > { %704 = vrot.lane.b32.xlu0 %v2006_v3, %s1737_s19 }
  0xe1   : > { %v2085_v7 = vpop.permute.xlu1 %803 }
  0xe3   : > { %v2092_v10 = vpop.permute.xlu2 %849 }
  0xe6   : > { %574 = vrot.lane.b32.xlu1 %v2041_v37, %s1736_s18  ;;  %876 = vrot.lane.b32.xlu2 %v1951_v22, %s1739_s21  ;;  %v2125_v25 = vpop.permute.xlu0 %799 }
  0xe7   : > { %566 = vrot.lane.b32.xlu0 %v2044_v38, %s1736_s18 }
  0xe9   : > { %v2100_v15 = vpop.permute.xlu1 %837 }
  0xeb   : > { %v2106_v58 = vpop.permute.xlu2 %973 }
  0xee   : > { %647 = vrot.lane.b32.xlu1 %v2041_v37, %s1735_s17  ;;  %564 = vrot.lane.b32.xlu2 %v2006_v3, %s1736_s18  ;;  %v2146_v35 = vpop.permute.xlu0 %902 }
  0xef   : > { %639 = vrot.lane.b32.xlu0 %v2044_v38, %s1735_s17 }
  0xf1   : > { %v2112_v18 = vpop.permute.xlu1 %845 }
  0xf6   : > { %706 = vrot.lane.b32.xlu1 %v2044_v38, %s1737_s19  ;;  %637 = vrot.lane.b32.xlu2 %v2006_v3, %s1735_s17 }
  0xf7   : > { %781 = vrot.lane.b32.xlu0 %v2041_v37, %s1738_s20 }
  0xf9   : > { %v2123_v28 = vpop.permute.xlu1 %906 }
  0xfe   : > { %568 = vrot.lane.b32.xlu1 %v2075_v0, %s1736_s18  ;;  %779 = vrot.lane.b32.xlu2 %v1989_v56, %s1738_s20 }
  0xff   : > { %872 = vrot.lane.b32.xlu0 %v2044_v38, %s1739_s21 }
 0x101   : > { %v2142_v33 = vpop.permute.xlu1 %969 }
 0x106   : > { %641 = vrot.lane.b32.xlu1 %v2075_v0, %s1735_s17  ;;  %714 = vrot.lane.b32.xlu2 %v2041_v37, %s1737_s19 }
 0x107   : > { %716 = vrot.lane.b32.xlu0 %v2090_v34, %s1737_s19 }
 0x10e   : > { %783 = vrot.lane.b32.xlu1 %v2090_v34, %s1738_s20  ;;  %773 = vrot.lane.b32.xlu2 %v2044_v38, %s1738_s20 }
 0x10f   : > { %775 = vrot.lane.b32.xlu0 %v2075_v0, %s1738_s20  ;;  %s1503_s20 = sshll.u32 %s1812_s9, 5 }
 0x110   : > { %s1403_s24 = scalar_lea.hbm %s2806_s8, %s1503_s20 }
 0x111   : > { %s1406_s10 = sshll.u32 %s1403_s24, 4  ;;  %s1407_s10 = int_to_ptr.hbm [resolvable:$true] %s1406_s10 }
 0x112   : > { %s1678_s12 = sshra.s32 %s1407_s10, 4  ;;  %s1679_s12 = int_to_ptr.hbm [resolvable:$true] %s1678_s12 }
 0x113   : > { %p1685_p0 = scmp.lt.s32.totalorder %s1679_s12, %s2806_s8 }
 0x116   : > { %874 = vrot.lane.b32.xlu1 %v2075_v0, %s1739_s21  ;;  %880 = vrot.lane.b32.xlu2 %v2041_v37, %s1739_s21 }
 0x117   : > { %882 = vrot.lane.b32.xlu0 %v2090_v34, %s1739_s21 }
 0x118   : > { %v563_v21 = vpop.permute.xlu2 %562 }
 0x11e   : > { %941 = vrot.lane.b32.xlu1 %v2075_v0, %s1741_s22  ;;  %939 = vrot.lane.b32.xlu2 %v2044_v38, %s1741_s22 }
 0x11f   : > { %949 = vrot.lane.b32.xlu0 %v2090_v34, %s1741_s22 }
 0x120   : > { %v571_v29 = vpop.permute.xlu2 %570 }
 0x121   : > { %v581_v30 = vsel %vm580_vm1, %v563_v21, %v571_v29  ;;  %v585_v32 = vsel %vm580_vm1, %v571_v29, %v563_v21 }
 0x122   : > { %v609_v45 = vmul.f32 %v2070_v60, %v585_v32  ;;  %v610_v46 = vmul.f32 %v2070_v60, %v581_v30  ;;  %v2188_v60 = vperm.slane %v2156_v43, 2 }
 0x124   : > { %v619_v29 = vmul.f32 %v2164_v44, %v609_v45  ;;  %v620_v30 = vmul.f32 %v2167_v48, %v610_v46 }
 0x126   : > { %1006 = vrot.lane.b32.xlu1 %v2044_v38, %s1742_s23  ;;  %947 = vrot.lane.b32.xlu2 %v2041_v37, %s1741_s22 }
 0x127   : > { %878 = vrot.lane.b32.xlu0 %v1989_v56, %s1739_s21 }
 0x128   : > { %v644_v39 = vpop.permute.xlu2 %643 }
 0x12e   : > { %1016 = vrot.lane.b32.xlu1 %v2090_v34, %s1742_s23  ;;  %576 = vrot.lane.b32.xlu2 %v2090_v34, %s1736_s18  ;;  %s296_s18 = sand.u32 1, %s1718_s28  }
 0x12f   : > { %1014 = vrot.lane.b32.xlu0 %v2041_v37, %s1742_s23  ;;  %s1392_s9 = scalar_lea.sflag [#allocation3], %s296_s18 }
 0x130   : > { %v636_v52 = vpop.permute.xlu1 %635  ;;  %v703_v55 = vpop.permute.xlu2 %702 }
 0x131   : > { %v711_v61 = vpop.permute.xlu0 %710  ;;  %v652_v53 = vsel %vm651_vm2, %v636_v52, %v644_v39  ;;  %v656_v36 = vsel %vm651_vm2, %v644_v39, %v636_v52 }
 0x132   : > { %v676_v63 = vmul.f32 %v662_v11, %v656_v36  ;;  %v677_v1 = vmul.f32 %v662_v11, %v652_v53  ;;  %v719_v5 = vsel %vm718_vm3, %v703_v55, %v711_v61  ;;  %v723_v40 = vsel %vm718_vm3, %v711_v61, %v703_v55 }
 0x133   : > { %v743_v19 = vmul.f32 %v2054_v49, %v723_v40  ;;  %v744_v21 = vmul.f32 %v2054_v49, %v719_v5  ;;  %v2208_v55 = vperm.slane %v2151_v41, 3  ;;  %v2211_v61 = vperm.slane %v2156_v43, 3 }
 0x134   : > { %v686_v32 = vmul.f32 %v2175_v47, %v676_v63  ;;  %v687_v39 = vmul.f32 %v2178_v50, %v677_v1 }
 0x135   : > { %v753_v11 = vmul.f32 %v2185_v62, %v743_v19  ;;  %v754_v36 = vmul.f32 %v2188_v60, %v744_v21 }
 0x136   : > { %v694_v52 = vadd.f32 %v686_v32, %v619_v29  ;;  %v695_v53 = vadd.f32 %v687_v39, %v620_v30  ;;  %1036 = vperm.xlu1 %1580, %v1872_v12   ;;  %649 = vrot.lane.b32.xlu2 %v2090_v34, %s1735_s17  ;;  %v852_v32 = vmul.f32 %v2100_v15, %v1948_v20 }
 0x137   : > { %898 = vperm.xlu0 %1575, %v1879_v13   ;;  %v853_v39 = vmul.f32 %v2100_v15, %v1951_v22 }
 0x138   : > { %v761_v49 = vadd.f32 %v753_v11, %v694_v52  ;;  %v762_v45 = vadd.f32 %v754_v36, %v695_v53  ;;  %v778_v46 = vpop.permute.xlu1 %777  ;;  %v770_v63 = vpop.permute.xlu2 %769 }
 0x139   : > { %v869_v1 = vpop.permute.xlu0 %868  ;;  %v786_v5 = vsel %vm785_vm4, %v770_v63, %v778_v46  ;;  %v790_v40 = vsel %vm785_vm4, %v778_v46, %v770_v63 }
 0x13a   : > { %v810_v19 = vmul.f32 %v2052_v42, %v790_v40  ;;  %v811_v21 = vmul.f32 %v2052_v42, %v786_v5  ;;  %v2809_v42 = vmov 8  }
 0x13c   : > { %v820_v29 = vmul.f32 %v2208_v55, %v810_v19  ;;  %v821_v30 = vmul.f32 %v2211_v61, %v811_v21 }
 0x13e   : > { %v828_v11 = vadd.f32 %v820_v29, %v761_v49  ;;  %v829_v52 = vadd.f32 %v821_v30, %v762_v45  ;;  %937 = vrot.lane.b32.xlu1 %v2006_v3, %s1741_s22  ;;  %708 = vrot.lane.b32.xlu2 %v2075_v0, %s1737_s19  ;;  %s1473_s19 = sshll.u32 %s296_s18, 5 }
 0x13f   : > { %935 = vrot.lane.b32.xlu0 %v1948_v20, %s1741_s22  ;;  %1584 = vset.pattern.permute.xlu1 %v2809_v42  ;;  %s298_s21 = scalar_lea.vmem [#allocation2], %s1473_s19 }
 0x140   : > { %v713_v53 = vpop.permute.xlu1 %712  ;;  %v877_v36 = vpop.permute.xlu2 %876  ;;  %1583 = vset.pattern.permute.xlu0 %v2811_v24  ;;  %v2234_v15 = vadd.f32 %v853_v39, %v829_v52  ;;  %v2236_v49 = vadd.f32 %v852_v32, %v828_v11  ;;  %s1404_s26 = sshll.u32 %s298_s21, 4  ;;  %s1405_s26 = int_to_ptr.vmem [resolvable:$true] %s1404_s26 }
 0x141   : > { %v573_v45 = vpop.permute.xlu0 %572  ;;  %v2240_v46 = vsel %vm884_vm5, %v869_v1, %v877_v36  ;;  %v2244_v63 = vsel %vm884_vm5, %v877_v36, %v869_v1 }
 0x146   : > { %1073 = vrot.lane.b32.xlu1 %v2044_v38, %s1744_s13  ;;  %1008 = vrot.lane.b32.xlu2 %v2075_v0, %s1742_s23 }
 0x147   : > { %945 = vrot.lane.b32.xlu0 %v1989_v56, %s1741_s22 }
 0x148   : > { %v772_v5 = vpop.permute.xlu1 %771  ;;  %v565_v40 = vpop.permute.xlu2 %564 }
 0x149   : > { %v646_v19 = vpop.permute.xlu0 %645  ;;  %v582_v21 = vsel %vm580_vm1, %v565_v40, %v573_v45  ;;  %v586_v1 = vsel %vm580_vm1, %v573_v45, %v565_v40 }
 0x14a   : > { %v611_v29 = vmul.f32 %v1993_v59, %v586_v1  ;;  %v612_v30 = vmul.f32 %v1993_v59, %v582_v21 }
 0x14c   : > { %v621_v42 = vmul.f32 %v2164_v44, %v611_v29  ;;  %v622_v24 = vmul.f32 %v2167_v48, %v612_v30 }
 0x14e   : > { %1083 = vrot.lane.b32.xlu1 %v2090_v34, %s1744_s13  ;;  %894 = vperm.xlu2 %1579, %v1884_v14  }
 0x14f   : > { %1081 = vrot.lane.b32.xlu0 %v2041_v37, %s1744_s13 }
 0x150   : > { %v2263_v32 = vpop.permute.xlu1 %870  ;;  %v638_v39 = vpop.permute.xlu2 %637 }
 0x151   : > { %v705_v11 = vpop.permute.xlu0 %704  ;;  %v653_v52 = vsel %vm651_vm2, %v638_v39, %v646_v19  ;;  %v657_v36 = vsel %vm651_vm2, %v646_v19, %v638_v39 }
 0x152   : > { %v720_v45 = vsel %vm718_vm3, %v705_v11, %v713_v53  ;;  %v724_v40 = vsel %vm718_vm3, %v713_v53, %v705_v11  ;;  %v678_v1 = vmul.f32 %v2016_v9, %v657_v36  ;;  %v679_v59 = vmul.f32 %v2016_v9, %v653_v52 }
 0x153   : > { %v745_v21 = vmul.f32 %v2036_v27, %v724_v40  ;;  %v746_v2 = vmul.f32 %v2036_v27, %v720_v45  ;;  %v2818_v9 = vmov 7  }
 0x154   : > { %v688_v19 = vmul.f32 %v2175_v47, %v678_v1  ;;  %v689_v39 = vmul.f32 %v2178_v50, %v679_v59 }
 0x155   : > { %v755_v23 = vmul.f32 %v2185_v62, %v745_v21  ;;  %v756_v53 = vmul.f32 %v2188_v60, %v746_v2  ;;  %v854_v21 = vmul.f32 %v2077_v4, %v2006_v3 }
 0x156   : > { %v696_v11 = vadd.f32 %v688_v19, %v621_v42  ;;  %v697_v36 = vadd.f32 %v689_v39, %v622_v24  ;;  %1103 = vperm.xlu1 %1584, %v1872_v12   ;;  %1581 = vset.pattern.permute.xlu2 %v2818_v9 }
 0x157   : > { %965 = vperm.xlu0 %1583, %v1879_v13   ;;  %1040 = vperm.xlu2 %1581, %v1892_v16  }
 0x158   : > { %v575_v27 = vpop.permute.xlu1 %574  ;;  %v763_v29 = vadd.f32 %v755_v23, %v696_v11  ;;  %v764_v30 = vadd.f32 %v756_v53, %v697_v36  ;;  %v780_v52 = vpop.permute.xlu2 %779  ;;  %v2819_v11 = vmov 6  }
 0x159   : > { %v567_v45 = vpop.permute.xlu0 %566  ;;  %v787_v40 = vsel %vm785_vm4, %v772_v5, %v780_v52  ;;  %v791_v2 = vsel %vm785_vm4, %v780_v52, %v772_v5  ;;  %v855_v5 = vmul.f32 %v2077_v4, %v1989_v56 }
 0x15a   : > { %v583_v12 = vsel %vm580_vm1, %v567_v45, %v575_v27  ;;  %v587_v24 = vsel %vm580_vm1, %v575_v27, %v567_v45  ;;  %v812_v42 = vmul.f32 %v2125_v25, %v791_v2  ;;  %v813_v1 = vmul.f32 %v2125_v25, %v787_v40 }
 0x15b   : > { %v613_v27 = vmul.f32 %v1984_v54, %v587_v24 }
 0x15c   : > { %v822_v23 = vmul.f32 %v2208_v55, %v812_v42  ;;  %v823_v59 = vmul.f32 %v2211_v61, %v813_v1 }
 0x15d   : > { %v623_v42 = vmul.f32 %v2164_v44, %v613_v27 }
 0x15e   : > { %v830_v19 = vadd.f32 %v822_v23, %v763_v29  ;;  %v831_v39 = vadd.f32 %v823_v59, %v764_v30  ;;  %1002 = vrot.lane.b32.xlu1 %v1948_v20, %s1742_s23  ;;  %v614_v29 = vmul.f32 %v1984_v54, %v583_v12 }
 0x15f   : > { %1010 = vrot.lane.b32.xlu0 %v1951_v22, %s1742_s23  ;;  %943 = vrot.lane.b32.xlu2 %v1951_v22, %s1741_s22  ;;  %s1684_s22 = scalar_lea.hbm %s2806_s8, 64 }
 0x160   : > { %v648_v25 = vpop.permute.xlu1 %647  ;;  %v715_v53 = vpop.permute.xlu2 %714  ;;  %1587 = vset.pattern.permute.xlu0 %v2818_v9  ;;  %1582 = vset.pattern.permute.xlu2 %v2819_v11  ;;  %v2311_v36 = vadd.f32 %v854_v21, %v830_v19  ;;  %v2313_v4 = vadd.f32 %v855_v5, %v831_v39  ;;  %v624_v1 = vmul.f32 %v2167_v48, %v614_v29 }
 0x161   : > { %v640_v30 = vpop.permute.xlu0 %639 }
 0x162   : > { %v654_v52 = vsel %vm651_vm2, %v640_v30, %v648_v25  ;;  %v658_v45 = vsel %vm651_vm2, %v648_v25, %v640_v30 }
 0x163   : > { %v680_v40 = vmul.f32 %v2008_v6, %v658_v45  ;;  %v681_v2 = vmul.f32 %v2008_v6, %v654_v52 }
 0x165   : > { %v690_v23 = vmul.f32 %v2175_v47, %v680_v40  ;;  %v691_v24 = vmul.f32 %v2178_v50, %v681_v2  ;;  %v2820_v2 = vmov 8  }
 0x166   : > { %1012 = vrot.lane.b32.xlu1 %v1989_v56, %s1742_s23 }
 0x167   : > { %v698_v54 = vadd.f32 %v690_v23, %v623_v42  ;;  %v699_v12 = vadd.f32 %v691_v24, %v624_v1  ;;  %1075 = vrot.lane.b32.xlu2 %v2075_v0, %s1744_s13  ;;  %1032 = vperm.xlu0 %1587, %v1879_v13   ;;  %v857_v42 = vmul.f32 %v2112_v18, %v2041_v37 }
 0x168   : > { %v707_v59 = vpop.permute.xlu1 %706  ;;  %v774_v6 = vpop.permute.xlu2 %773 }
 0x169   : > { %v782_v21 = vpop.permute.xlu0 %781  ;;  %v721_v5 = vsel %vm718_vm3, %v707_v59, %v715_v53  ;;  %v725_v19 = vsel %vm718_vm3, %v715_v53, %v707_v59  ;;  %v2358_v59 = vperm.slane %v2151_v41, 5 }
 0x16a   : > { %v747_v39 = vmul.f32 %v2110_v17, %v725_v19  ;;  %v748_v25 = vmul.f32 %v2110_v17, %v721_v5  ;;  %v788_v11 = vsel %vm785_vm4, %v774_v6, %v782_v21  ;;  %v792_v27 = vsel %vm785_vm4, %v782_v21, %v774_v6 }
 0x16b   : > { %v814_v13 = vmul.f32 %v2085_v7, %v792_v27  ;;  %v815_v29 = vmul.f32 %v2085_v7, %v788_v11  ;;  %v856_v7 = vmul.f32 %v2112_v18, %v2044_v38 }
 0x16c   : > { %v757_v30 = vmul.f32 %v2185_v62, %v747_v39  ;;  %v758_v52 = vmul.f32 %v2188_v60, %v748_v25  ;;  %v1137_v39 = vld [vmem:[%s2803_s5 + $0x8] sm:$0xff] }
 0x16d   : > { %v824_v40 = vmul.f32 %v2208_v55, %v814_v13  ;;  %v825_v17 = vmul.f32 %v2211_v61, %v815_v29 }
 0x16e   : > { %v765_v45 = vadd.f32 %v757_v30, %v698_v54  ;;  %v766_v53 = vadd.f32 %v758_v52, %v699_v12  ;;  %1069 = vrot.lane.b32.xlu1 %v1948_v20, %s1744_s13  ;;  %v2361_v20 = vperm.slane %v2156_v43, 5  ;;  %v2388_v52 = vperm.slane %v2151_v41, 6 }
 0x16f   : > { %961 = vperm.xlu2 %1582, %v1884_v14   ;;  %1588 = vset.pattern.permute.xlu0 %v2820_v2 }
 0x170   : > { %v832_v1 = vadd.f32 %v824_v40, %v765_v45  ;;  %v833_v23 = vadd.f32 %v825_v17, %v766_v53  ;;  %v569_v24 = vpop.permute.xlu1 %568  ;;  %v881_v54 = vpop.permute.xlu2 %880  ;;  %1095 = vperm.xlu0 %1588, %v1884_v14  }
 0x171   : > { %v873_v12 = vpop.permute.xlu0 %872 }
 0x172   : > { %v864_v6 = vadd.f32 %v856_v7, %v832_v1  ;;  %v865_v21 = vadd.f32 %v857_v42, %v833_v23  ;;  %v887_v38 = vsel %vm884_vm5, %v873_v12, %v881_v54  ;;  %v891_v37 = vsel %vm884_vm5, %v881_v54, %v873_v12  ;;  %v1139_v12 = vld [vmem:[%s2803_s5 + $0x18] sm:$0xff] }
 0x173   : > { %v913_v18 = vmul.f32 %v2146_v35, %v887_v38  ;;  %v914_v5 = vmul.f32 %v2146_v35, %v891_v37  ;;  %v2821_v35 = vmov 0  }
 0x175   : > { %v923_v14 = vmul.f32 %v2358_v59, %v913_v18  ;;  %v924_v19 = vmul.f32 %v2361_v20, %v914_v5 }
 0x176   : > { %1077 = vrot.lane.b32.xlu1 %v1951_v22, %s1744_s13  ;;  %v1658_v22 = vld [vmem:[%s2801_s3 + $0x8] sm:$0xff] }
 0x177   : > { %v931_v25 = vadd.f32 %v923_v14, %v864_v6  ;;  %v932_v11 = vadd.f32 %v924_v19, %v865_v21  ;;  %1585 = vset.pattern.permute.xlu2 %v2820_v2 }
 0x178   : > { %v642_v27 = vpop.permute.xlu1 %641  ;;  %1107 = vperm.xlu2 %1585, %v1892_v16   ;;  %v940_v13 = vpop.permute.xlu2 %939  ;;  %1591 = vset.pattern.permute.xlu0 %v2821_v35  ;;  %v2391_v16 = vperm.slane %v2156_v43, 6 }
 0x179   : > { %v2379_v29 = vpop.permute.xlu0 %716  ;;  %1147 = vperm.xlu0 %1591, %v1137_v39   ;;  %v1334_v39 = vld [vmem:[%s2805_s7] sm:$0xff] }
 0x17e   : > { %1099 = vperm.xlu1 %1584, %v1658_v22  }
 0x180   : > { %v784_v30 = vpop.permute.xlu1 %783  ;;  %1004 = vrot.lane.b32.xlu2 %v2006_v3, %s1742_s23  ;;  %v948_v45 = vpop.permute.xlu2 %947 }
 0x181   : > { %v776_v53 = vpop.permute.xlu0 %775  ;;  %v954_v40 = vsel %vm951_vm6, %v940_v13, %v948_v45  ;;  %v958_v17 = vsel %vm951_vm6, %v948_v45, %v940_v13  ;;  %1586 = vset.pattern.permute.xlu2 %v2818_v9 }
 0x182   : > { %v789_v2 = vsel %vm785_vm4, %v776_v53, %v784_v30  ;;  %v793_v7 = vsel %vm785_vm4, %v784_v30, %v776_v53  ;;  %v980_v42 = vmul.f32 %v2142_v33, %v954_v40  ;;  %v981_v1 = vmul.f32 %v2142_v33, %v958_v17  ;;  %v1659_v33 = vld [vmem:[%s2801_s3] sm:$0xff] }
 0x184   : > { %v990_v23 = vmul.f32 %v2388_v52, %v980_v42  ;;  %v991_v54 = vmul.f32 %v2391_v16, %v981_v1 }
 0x186   : > { %v2409_v6 = vadd.f32 %v990_v23, %v931_v25  ;;  %v2411_v9 = vadd.f32 %v991_v54, %v932_v11  ;;  %1590 = vset.pattern.permute.xlu1 %v2821_v35 }
 0x187   : > { %1157 = vperm.xlu1 %1590, %v1139_v12  }
 0x188   : > { %v875_v21 = vpop.permute.xlu1 %874  ;;  %1028 = vperm.xlu2 %1586, %v1659_v33   ;;  %v577_v38 = vpop.permute.xlu2 %576  ;;  %v817_v33 = vmul.f32 %v2062_v51, %v789_v2  ;;  %v1138_v2 = vld [vmem:[%s2803_s5 + $0x10] sm:$0xff] }
 0x189   : > { %v883_v37 = vpop.permute.xlu0 %882  ;;  %v584_v18 = vsel %vm580_vm1, %v569_v24, %v577_v38  ;;  %v588_v5 = vsel %vm580_vm1, %v577_v38, %v569_v24 }
 0x18a   : > { %v888_v14 = vsel %vm884_vm5, %v875_v21, %v883_v37  ;;  %v892_v19 = vsel %vm884_vm5, %v883_v37, %v875_v21  ;;  %v615_v25 = vmul.f32 %v2087_v8, %v588_v5  ;;  %v616_v11 = vmul.f32 %v2087_v8, %v584_v18 }
 0x18b   : > { %v816_v21 = vmul.f32 %v2062_v51, %v793_v7  ;;  %v827_v51 = vmul.f32 %v2211_v61, %v817_v33  ;;  %v916_v37 = vmul.f32 %v2123_v28, %v892_v19 }
 0x18c   : > { %v625_v17 = vmul.f32 %v2164_v44, %v615_v25  ;;  %v626_v42 = vmul.f32 %v2167_v48, %v616_v11 }
 0x18d   : > { %v826_v7 = vmul.f32 %v2208_v55, %v816_v21 }
 0x18f   : > { %1338 = vperm.xlu1 %1590, %v1334_v39  }
 0x190   : > { %v942_v13 = vpop.permute.xlu1 %941  ;;  %1071 = vrot.lane.b32.xlu2 %v2006_v3, %s1744_s13  ;;  %v650_v24 = vpop.permute.xlu2 %649 }
 0x191   : > { %v950_v22 = vpop.permute.xlu0 %949  ;;  %v655_v30 = vsel %vm651_vm2, %v642_v27, %v650_v24  ;;  %v659_v45 = vsel %vm651_vm2, %v650_v24, %v642_v27  ;;  %1589 = vset.pattern.permute.xlu2 %v2821_v35 }
 0x192   : > { %v955_v53 = vsel %vm951_vm6, %v942_v13, %v950_v22  ;;  %v959_v8 = vsel %vm951_vm6, %v950_v22, %v942_v13  ;;  %v682_v40 = vmul.f32 %v2038_v31, %v659_v45  ;;  %v683_v3 = vmul.f32 %v2038_v31, %v655_v30  ;;  %v1136_v45 = vld [vmem:[%s2803_s5] sm:$0xff] }
 0x193   : > { %v982_v55 = vmul.f32 %v2106_v58, %v955_v53  ;;  %v983_v61 = vmul.f32 %v2106_v58, %v959_v8 }
 0x194   : > { %v692_v1 = vmul.f32 %v2175_v47, %v682_v40  ;;  %v693_v27 = vmul.f32 %v2178_v50, %v683_v3  ;;  %v2487_v40 = vperm.slane %v2151_v41, 7  ;;  %v2490_v3 = vperm.slane %v2156_v43, 7 }
 0x195   : > { %v992_v58 = vmul.f32 %v2388_v52, %v982_v55  ;;  %v993_v24 = vmul.f32 %v2391_v16, %v983_v61 }
 0x196   : > { %v700_v23 = vadd.f32 %v692_v1, %v625_v17  ;;  %v701_v35 = vadd.f32 %v693_v27, %v626_v42 }
 0x198   : > { %v1007_v54 = vpop.permute.xlu1 %1006  ;;  %1079 = vrot.lane.b32.xlu2 %v1989_v56, %s1744_s13  ;;  %v709_v12 = vpop.permute.xlu2 %708  ;;  %s1680_s13 = scalar_lea.hbm %s1679_s12, 32 }
 0x199   : > { %v879_v31 = vpop.permute.xlu0 %878  ;;  %v722_v44 = vsel %vm718_vm3, %v709_v12, %v2379_v29  ;;  %v726_v48 = vsel %vm718_vm3, %v2379_v29, %v709_v12  ;;  %v915_v29 = vmul.f32 %v2123_v28, %v888_v14  ;;  %p1681_p11 = scmp.ne.s32.totalorder %s1679_s12, %s1680_s13  ;;  %p1686_p1 = scmp.lt.s32.totalorder %s1684_s22, %s1680_s13 }
 0x19a   : > { %v749_v47 = vmul.f32 %v2064_v57, %v726_v48  ;;  %v750_v50 = vmul.f32 %v2064_v57, %v722_v44  ;;  %v886_v17 = vsel %vm884_vm5, %v2263_v32, %v879_v31  ;;  %v890_v42 = vsel %vm884_vm5, %v879_v31, %v2263_v32 }
 0x19b   : > { %p1682_p12 = pnand %p1681_p11, %p1829_p5  ;;  %p1687_p2 = por %p1686_p1, %p1685_p0 }
 0x19c   : > { %v759_v56 = vmul.f32 %v2185_v62, %v749_v47  ;;  %v760_v38 = vmul.f32 %v2188_v60, %v750_v50  ;;  %v858_v62 = vmul.f32 %v2092_v10, %v2075_v0  ;;  %v859_v60 = vmul.f32 %v2092_v10, %v2090_v34 }
 0x19d   : > { %v925_v0 = vmul.f32 %v2358_v59, %v915_v29  ;;  %v926_v34 = vmul.f32 %v2361_v20, %v916_v37  ;;  %p1683_p13 = pneg %p1682_p12 }
 0x19e   : > { %v767_v18 = vadd.f32 %v759_v56, %v700_v23  ;;  %v768_v57 = vadd.f32 %v760_v38, %v701_v35 }
 0x19f   : > { %p1688_p3 = pnand %p1687_p2, %p1683_p13 }
 0x1a0   : > { %v834_v5 = vadd.f32 %v826_v7, %v767_v18  ;;  %v835_v39 = vadd.f32 %v827_v51, %v768_v57  ;;  %v1017_v25 = vpop.permute.xlu1 %1016  ;;  %1152 = vperm.xlu2 %1589, %v1138_v2   ;;  %v1009_v11 = vpop.permute.xlu2 %1008 }
 0x1a1   : > { %v1015_v14 = vpop.permute.xlu0 %1014  ;;  %v1022_v28 = vsel %vm1018_vm7, %v1009_v11, %v1017_v25  ;;  %v1026_v19 = vsel %vm1018_vm7, %v1017_v25, %v1009_v11 }
 0x1a2   : > { %v866_v10 = vadd.f32 %v858_v62, %v834_v5  ;;  %v867_v13 = vadd.f32 %v859_v60, %v835_v39  ;;  %v1021_v1 = vsel %vm1018_vm7, %v1007_v54, %v1015_v14  ;;  %v1025_v27 = vsel %vm1018_vm7, %v1015_v14, %v1007_v54 }
 0x1a4   : > { %v933_v22 = vadd.f32 %v925_v0, %v866_v10  ;;  %v934_v30 = vadd.f32 %v926_v34, %v867_v13 }
 0x1a6   : > { %v1000_v53 = vadd.f32 %v992_v58, %v933_v22  ;;  %v1001_v8 = vadd.f32 %v993_v24, %v934_v30 }
 0x1a8   : > { %v1037_v23 = vpop.permute.xlu1 %1036  ;;  %1142 = vperm.xlu2 %1589, %v1136_v45   ;;  %v895_v41 = vpop.permute.xlu2 %894 }
 0x1a9   : > { %v899_v35 = vpop.permute.xlu0 %898  ;;  %v1047_v43 = vmul.f32 %v1037_v23, %v1021_v1  ;;  %v1048_v12 = vmul.f32 %v1037_v23, %v1025_v27  ;;  %v909_v21 = vmul.f32 %v895_v41, %v2240_v46  ;;  %v910_v33 = vmul.f32 %v895_v41, %v2244_v63  ;;  %v1335_v63 = vld [vmem:[%s2805_s7 + $0x8] sm:$0xff] }
 0x1aa   : > { %v911_v44 = vmul.f32 %v899_v35, %v886_v17  ;;  %v912_v48 = vmul.f32 %v899_v35, %v890_v42 }
 0x1ab   : > { %v1057_v32 = vmul.f32 %v2487_v40, %v1047_v43  ;;  %v1058_v31 = vmul.f32 %v2490_v3, %v1048_v12  ;;  %v919_v47 = vmul.f32 %v2358_v59, %v909_v21  ;;  %v920_v54 = vmul.f32 %v2361_v20, %v910_v33 }
 0x1ac   : > { %v921_v50 = vmul.f32 %v2358_v59, %v911_v44  ;;  %v922_v56 = vmul.f32 %v2361_v20, %v912_v48 }
 0x1ad   : > { %v927_v38 = vadd.f32 %v919_v47, %v2236_v49  ;;  %v928_v46 = vadd.f32 %v920_v54, %v2234_v15  ;;  %v2516_v7 = vadd.f32 %v1057_v32, %v2409_v6  ;;  %v2519_v51 = vadd.f32 %v1058_v31, %v2411_v9 }
 0x1ae   : > { %v929_v2 = vadd.f32 %v921_v50, %v2311_v36  ;;  %v930_v59 = vadd.f32 %v922_v56, %v2313_v4 }
 0x1b0   : > { %v938_v29 = vpop.permute.xlu1 %937  ;;  %1343 = vperm.xlu2 %1589, %v1335_v63   ;;  %v1592_v63 = vld [vmem:[%s2802_s4 + $0x10] ss:$0 sm:$0xff] }
 0x1b1   : > { %v936_v20 = vpop.permute.xlu0 %935  ;;  %v1041_v49 = vpop.permute.xlu2 %1040 }
 0x1b2   : > { %v1049_v37 = vmul.f32 %v1041_v49, %v1022_v28  ;;  %v1050_v15 = vmul.f32 %v1041_v49, %v1026_v19 }
 0x1b4   : > { %v1059_v18 = vmul.f32 %v2487_v40, %v1049_v37  ;;  %v1060_v57 = vmul.f32 %v2490_v3, %v1050_v15 }
 0x1b6   : > { %v2525_v62 = vadd.f32 %v1059_v18, %v1000_v53  ;;  %v2527_v6 = vadd.f32 %v1060_v57, %v1001_v8 }
 0x1b8   : > { %v1074_v9 = vpop.permute.xlu1 %1073 }
 0x1b9   : > { %v946_v60 = vpop.permute.xlu0 %945  ;;  %v944_v55 = vpop.permute.xlu2 %943 }
 0x1ba   : > { %v953_v39 = vsel %vm951_vm6, %v938_v29, %v946_v60  ;;  %v957_v25 = vsel %vm951_vm6, %v946_v60, %v938_v29  ;;  %v952_v11 = vsel %vm951_vm6, %v936_v20, %v944_v55  ;;  %v956_v14 = vsel %vm951_vm6, %v944_v55, %v936_v20 }
 0x1c0   : > { %v1084_v36 = vpop.permute.xlu1 %1083 }
 0x1c1   : > { %v1082_v61 = vpop.permute.xlu0 %1081  ;;  %v1076_v4 = vpop.permute.xlu2 %1075 }
 0x1c2   : > { %v1089_v44 = vsel %vm1085_vm8, %v1076_v4, %v1084_v36  ;;  %v1093_v48 = vsel %vm1085_vm8, %v1084_v36, %v1076_v4  ;;  %v1088_v56 = vsel %vm1085_vm8, %v1074_v9, %v1082_v61 }
 0x1c8   : > { %v1104_v5 = vpop.permute.xlu1 %1103 }
 0x1c9   : > { %v966_v28 = vpop.permute.xlu0 %965  ;;  %v962_v19 = vpop.permute.xlu2 %961 }
 0x1ca   : > { %v978_v0 = vmul.f32 %v966_v28, %v953_v39  ;;  %v979_v34 = vmul.f32 %v966_v28, %v957_v25  ;;  %v976_v10 = vmul.f32 %v962_v19, %v952_v11  ;;  %v977_v13 = vmul.f32 %v962_v19, %v956_v14 }
 0x1cc   : > { %v988_v58 = vmul.f32 %v2388_v52, %v978_v0  ;;  %v989_v24 = vmul.f32 %v2391_v16, %v979_v34  ;;  %v986_v22 = vmul.f32 %v2388_v52, %v976_v10  ;;  %v987_v30 = vmul.f32 %v2391_v16, %v977_v13 }
 0x1ce   : > { %v996_v45 = vadd.f32 %v988_v58, %v929_v2  ;;  %v997_v53 = vadd.f32 %v989_v24, %v930_v59  ;;  %v2541_v8 = vadd.f32 %v986_v22, %v927_v38  ;;  %v2543_v17 = vadd.f32 %v987_v30, %v928_v46  ;;  %v1593_v2 = vld [vmem:[%s2802_s4 + $0x18] ss:$0 sm:$0xff] }
 0x1cf   : > { %v1092_v38 = vsel %vm1085_vm8, %v1082_v61, %v1074_v9  ;;  %v1114_v59 = vmul.f32 %v1104_v5, %v1088_v56 }
 0x1d0   : > { %v1003_v42 = vpop.permute.xlu1 %1002  ;;  %v1115_v29 = vmul.f32 %v1104_v5, %v1092_v38 }
 0x1d1   : > { %v1011_v41 = vpop.permute.xlu0 %1010  ;;  %v1124_v36 = vmul.f32 %v1592_v63, %v1114_v59 }
 0x1d2   : > { %v1108_v1 = vpop.permute.xlu2 %1107  ;;  %v1125_v61 = vmul.f32 %v1593_v2, %v1115_v29  ;;  %v1019_v11 = vsel %vm1018_vm7, %v1003_v42, %v1011_v41  ;;  %v1023_v14 = vsel %vm1018_vm7, %v1011_v41, %v1003_v42 }
 0x1d3   : > { %v1116_v47 = vmul.f32 %v1108_v1, %v1089_v44  ;;  %v1117_v54 = vmul.f32 %v1108_v1, %v1093_v48 }
 0x1d5   : > { %v1126_v15 = vmul.f32 %v1592_v63, %v1116_v47  ;;  %v1127_v18 = vmul.f32 %v1593_v2, %v1117_v54 }
 0x1d7   : > { %v1134_v19 = vadd.f32 %v1126_v15, %v2525_v62  ;;  %v1135_v0 = vadd.f32 %v1127_v18, %v2527_v6 }
 0x1d8   : > { %v1013_v27 = vpop.permute.xlu1 %1012 }
 0x1d9   : > { %v1033_v12 = vpop.permute.xlu0 %1032 }
 0x1da   : > { %v1005_v23 = vpop.permute.xlu2 %1004 }
 0x1db   : > { %v1020_v52 = vsel %vm1018_vm7, %v1005_v23, %v1013_v27  ;;  %v1024_v16 = vsel %vm1018_vm7, %v1013_v27, %v1005_v23 }
 0x1dc   : > { %v1045_v32 = vmul.f32 %v1033_v12, %v1020_v52  ;;  %v1046_v31 = vmul.f32 %v1033_v12, %v1024_v16 }
 0x1de   : > { %v1055_v20 = vmul.f32 %v2487_v40, %v1045_v32  ;;  %v1056_v49 = vmul.f32 %v2490_v3, %v1046_v31 }
 0x1e0   : > { %v1070_v35 = vpop.permute.xlu1 %1069  ;;  %v1063_v4 = vadd.f32 %v1055_v20, %v996_v45  ;;  %v1064_v39 = vadd.f32 %v1056_v49, %v997_v53  ;;  %v1132_v45 = vadd.f32 %v1124_v36, %v2516_v7  ;;  %v1133_v53 = vadd.f32 %v1125_v61, %v2519_v51 }
 0x1e2   : > { %v1029_v43 = vpop.permute.xlu2 %1028  ;;  %v1096_v50 = vpop.permute.xlu0 %1095 }
 0x1e3   : > { %v1043_v24 = vmul.f32 %v1029_v43, %v1019_v11  ;;  %v1044_v22 = vmul.f32 %v1029_v43, %v1023_v14 }
 0x1e5   : > { %v1054_v16 = vmul.f32 %v2490_v3, %v1044_v22 }
 0x1e8   : > { %v1078_v21 = vpop.permute.xlu1 %1077 }
 0x1e9   : > { %v1086_v34 = vsel %vm1085_vm8, %v1070_v35, %v1078_v21  ;;  %v1090_v10 = vsel %vm1085_vm8, %v1078_v21, %v1070_v35  ;;  %v1053_v21 = vmul.f32 %v2487_v40, %v1043_v24  ;;  %v1062_v40 = vadd.f32 %v1054_v16, %v2543_v17 }
 0x1ea   : > { %v1072_v33 = vpop.permute.xlu2 %1071  ;;  %v1110_v26 = vmul.f32 %v1096_v50, %v1086_v34  ;;  %v1111_v23 = vmul.f32 %v1096_v50, %v1090_v10 }
 0x1eb   : > { %v1148_v28 = vpop.permute.xlu0 %1147  ;;  %v1061_v38 = vadd.f32 %v1053_v21, %v2541_v8 }
 0x1ec   : > { %v1120_v31 = vmul.f32 %v1592_v63, %v1110_v26  ;;  %v1121_v54 = vmul.f32 %v1593_v2, %v1111_v23 }
 0x1ee   : > { %v1128_v59 = vadd.f32 %v1120_v31, %v1061_v38  ;;  %v1129_v3 = vadd.f32 %v1121_v54, %v1062_v40 }
 0x1f0   : > { %v1100_v46 = vpop.permute.xlu1 %1099 }
 0x1f2   : > { %v1080_v37 = vpop.permute.xlu2 %1079 }
 0x1f3   : > { %v1087_v57 = vsel %vm1085_vm8, %v1072_v33, %v1080_v37  ;;  %v1091_v9 = vsel %vm1085_vm8, %v1080_v37, %v1072_v33 }
 0x1f4   : > { %v1112_v60 = vmul.f32 %v1100_v46, %v1087_v57  ;;  %v1113_v55 = vmul.f32 %v1100_v46, %v1091_v9 }
 0x1f6   : > { %v1122_v5 = vmul.f32 %v1592_v63, %v1112_v60  ;;  %v1123_v25 = vmul.f32 %v1593_v2, %v1113_v55 }
 0x1f8   : > { %v1130_v13 = vadd.f32 %v1122_v5, %v1063_v4  ;;  %v1131_v58 = vadd.f32 %v1123_v25, %v1064_v39 }
 0x1f9   : > { %v1158_v30 = vpop.permute.xlu1 %1157 }
 0x1fa   : > { %v2582_v42 = vadd.f32 %v1148_v28, %v1130_v13  ;;  %v2584_v62 = vadd.f32 %v1148_v28, %v1131_v58  ;;  %v2586_v6 = vadd.f32 %v1158_v30, %v1134_v19  ;;  %v2588_v1 = vadd.f32 %v1158_v30, %v1135_v0  ;;  %v1153_v27 = vpop.permute.xlu2 %1152 }
 0x1fb   : > { %v2590_v41 = vadd.f32 %v1153_v27, %v1132_v45  ;;  %v2592_v35 = vadd.f32 %v1153_v27, %v1133_v53 }
 0x1fc   : > { %v1170_v43 = vsub.f32 0.0, %v2582_v42  ;;  %v1171_v7 = vsub.f32 0.0, %v2584_v62  ;;  %v1174_v51 = vsub.f32 0.0, %v2586_v6  ;;  %v1175_v12 = vsub.f32 0.0, %v2588_v1 }
 0x1fd   : > { %v1172_v33 = vsub.f32 0.0, %v2590_v41  ;;  %v1173_v52 = vsub.f32 0.0, %v2592_v35 }
 0x1fe   : > { %v1180_v44 = vmul.f32 1.442695, %v1170_v43  ;;  %v1182_v48 = vmul.f32 1.442695, %v1171_v7  ;;  %v1188_v32 = vmul.f32 1.442695, %v1174_v51 }
 0x1ff   : > { %v1190_v47 = vmul.f32 1.442695, %v1175_v12  ;;  %v1184_v50 = vmul.f32 1.442695, %v1172_v33  ;;  %v1186_v56 = vmul.f32 1.442695, %v1173_v52 }
 0x200   : > { %1626 = vpow2.f32 %v1180_v44 }
 0x201   : > { %1628 = vpow2.f32 %v1182_v48 }
 0x202   : > { %1630 = vpow2.f32 %v1188_v32  ;;  %v1143_v46 = vpop.permute.xlu2 %1142 }
 0x203   : > { %1632 = vpow2.f32 %v1190_v47  ;;  %v2604_v29 = vadd.f32 %v1143_v46, %v1128_v59  ;;  %v2606_v20 = vadd.f32 %v1143_v46, %v1129_v3 }
 0x204   : > { %1634 = vpow2.f32 %v1184_v50 }
 0x205   : > { %1636 = vpow2.f32 %v1186_v56  ;;  %v1168_v17 = vsub.f32 0.0, %v2604_v29  ;;  %v1169_v57 = vsub.f32 0.0, %v2606_v20 }
 0x206   : > { %v1627_v63 = vpop.eup %1626 }
 0x207   : > { %v1629_v2 = vpop.eup %1628  ;;  %v2608_v49 = vadd.f32 1.0, %v1627_v63  ;;  %v1176_v4 = vmul.f32 1.442695, %v1168_v17  ;;  %v1178_v39 = vmul.f32 1.442695, %v1169_v57 }
 0x208   : > { %v1631_v37 = vpop.eup %1630  ;;  %v2610_v15 = vadd.f32 1.0, %v1629_v2 }
 0x209   : > { %v1633_v8 = vpop.eup %1632  ;;  %1638 = vrcp.f32 %v2608_v49  ;;  %v2616_v60 = vadd.f32 1.0, %v1631_v37  ;;  %v1239_v10 = vand.u32 2147483647, %v2608_v49  ;;  %v1241_v13 = vand.u32 2147483648, %v2608_v49 }
 0x20a   : > { %v1635_v18 = vpop.eup %1634  ;;  %1640 = vrcp.f32 %v2610_v15  ;;  %v2618_v55 = vadd.f32 1.0, %v1633_v8  ;;  %v1254_v24 = vand.u32 2147483647, %v2610_v15  ;;  %vm1235_vm1 = vweird.f32 %v2608_v49 }
 0x20b   : > { %v1637_v9 = vpop.eup %1636  ;;  %v2620_v36 = vadd.f32 1.0, %v1635_v18  ;;  %1642 = vrcp.f32 %v2616_v60  ;;  %v1301_v11 = vand.u32 2147483648, %v2616_v60  ;;  %v1299_v19 = vand.u32 2147483647, %v2616_v60 }
 0x20c   : > { %v2622_v61 = vadd.f32 1.0, %v1637_v9  ;;  %1644 = vrcp.f32 %v2618_v55  ;;  %vm1295_vm10 = vweird.f32 %v2616_v60  ;;  %vm1310_vm14 = vweird.f32 %v2618_v55 }
 0x20d   : > { %1646 = vrcp.f32 %v2620_v36  ;;  %v1271_v28 = vand.u32 2147483648, %v2620_v36  ;;  %v1269_v0 = vand.u32 2147483647, %v2620_v36  ;;  %vm1265_vm9 = vweird.f32 %v2620_v36 }
 0x20e   : > { %1648 = vrcp.f32 %v2622_v61  ;;  %v1302_v45 = vor.u32 1.1754944e-38, %v1301_v11  ;;  %vm2648_vm11 = vcmp.eq.f32.partialorder %v1299_v19, 8.507059e+37  ;;  %vm1280_vm12 = vweird.f32 %v2622_v61 }
 0x20f   : > { %v2626_v5 = vpop.eup %1638  ;;  %1650 = vpow2.f32 %v1176_v4  ;;  %v1272_v26 = vor.u32 1.1754944e-38, %v1271_v28  ;;  %vm2656_vm13 = vcmp.eq.f32.partialorder %v1269_v0, 8.507059e+37  ;;  %v1284_v33 = vand.u32 2147483647, %v2622_v61 }
 0x210   : > { %v2629_v25 = vpop.eup %1640  ;;  %v1231_v14 = vmul.f32 %v2626_v5, %v2608_v49  ;;  %1652 = vpow2.f32 %v1178_v39  ;;  %v1286_v52 = vand.u32 2147483648, %v2622_v61  ;;  %v1314_v32 = vand.u32 2147483647, %v2618_v55 }
 0x211   : > { %v1643_v34 = vpop.eup %1642  ;;  %v1246_v58 = vmul.f32 %v2629_v25, %v2610_v15  ;;  %vm1236_vm15 = vweird.f32 %v2626_v5  ;;  %v1316_v46 = vand.u32 2147483648, %v2618_v55  ;;  %vm1250_vm4 = vweird.f32 %v2610_v15 }
 0x212   : > { %v2643_v22 = vpop.eup %1644  ;;  %v1291_v30 = vmul.f32 %v1643_v34, %v2616_v60  ;;  %v1232_v27 = vsub.f32 1.0, %v1231_v14  ;;  %vm1296_vm0 = vweird.f32 %v1643_v34  ;;  %vm2678_vm6 = vcmp.eq.f32.partialorder %v1284_v33, 8.507059e+37 }
 0x213   : > { %v1647_v53 = vpop.eup %1646  ;;  %v1306_v43 = vmul.f32 %v2643_v22, %v2618_v55  ;;  %v1247_v44 = vsub.f32 1.0, %v1246_v58  ;;  %vm1297_vm5 = vmor %vm1295_vm10, %vm1296_vm0  ;;  %vm1311_vm7 = vweird.f32 %v2643_v22  ;;  %v1287_v4 = vor.u32 1.1754944e-38, %v1286_v52 }
 0x214   : > { %v1649_v7 = vpop.eup %1648  ;;  %v1261_v51 = vmul.f32 %v1647_v53, %v2620_v36  ;;  %v1292_v21 = vsub.f32 1.0, %v1291_v30  ;;  %v1233_v59 = vmul.f32 %v2626_v5, %v1232_v27  ;;  %vm1266_vm2 = vweird.f32 %v1647_v53 }
 0x215   : > { %v1651_v16 = vpop.eup %1650  ;;  %v1276_v48 = vmul.f32 %v1649_v7, %v2622_v61  ;;  %v1307_v56 = vsub.f32 1.0, %v1306_v43  ;;  %vm1281_vm3 = vweird.f32 %v1649_v7  ;;  %v1248_v18 = vmul.f32 %v2629_v25, %v1247_v44  ;;  %vm1267_vm8 = vmor %vm1265_vm9, %vm1266_vm2 }
 0x216   : > { %v1653_v31 = vpop.eup %1652  ;;  %v2666_v47 = vadd.f32 1.0, %v1651_v16  ;;  %v1262_v54 = vsub.f32 1.0, %v1261_v51  ;;  %v1293_v50 = vmul.f32 %v1643_v34, %v1292_v21  ;;  %v1234_v39 = vadd.f32 %v2626_v5, %v1233_v59  ;;  %vm1282_vm10 = vmor %vm1280_vm12, %vm1281_vm3 }
 0x217   : > { %v2668_v38 = vadd.f32 1.0, %v1653_v31  ;;  %v1277_v40 = vsub.f32 1.0, %v1276_v48  ;;  %v1308_v17 = vmul.f32 %v2643_v22, %v1307_v56  ;;  %vm1312_vm9 = vmor %vm1310_vm14, %vm1311_vm7  ;;  %v1317_v0 = vor.u32 1.1754944e-38, %v1316_v46 }
 0x218   : > { %1654 = vrcp.f32 %v2666_v47  ;;  %v1263_v3 = vmul.f32 %v1647_v53, %v1262_v54  ;;  %v1294_v63 = vadd.f32 %v1643_v34, %v1293_v50  ;;  %vm1251_vm12 = vweird.f32 %v2629_v25 }
 0x219   : > { %1656 = vrcp.f32 %v2668_v38  ;;  %v1278_v2 = vmul.f32 %v1649_v7, %v1277_v40  ;;  %v1309_v14 = vadd.f32 %v2643_v22, %v1308_v17  ;;  %v1249_v55 = vadd.f32 %v2629_v25, %v1248_v18  ;;  %v1660_v17 = vld [vmem:[%s1853_s25] sm:$0xff] }
 0x21a   : > { %v1264_v37 = vadd.f32 %v1647_v53, %v1263_v3  ;;  %v1298_v57 = vsel %vm1297_vm5, %v1643_v34, %v1294_v63  ;;  %vm2719_vm14 = vcmp.eq.f32.partialorder %v1239_v10, 8.507059e+37  ;;  %v1242_v43 = vor.u32 1.1754944e-38, %v1241_v13 }
 0x21b   : > { %v1279_v9 = vadd.f32 %v1649_v7, %v1278_v2  ;;  %v1303_v11 = vsel %vm2648_vm11, %v1302_v45, %v1298_v57  ;;  %v1313_v61 = vsel %vm1312_vm9, %v2643_v22, %v1309_v14  ;;  %vm1315_vm11 = vcmp.eq.f32.partialorder %v1314_v32, 8.507059e+37  ;;  %v1661_v57 = vld [vmem:[%s1853_s25 + $0x8] sm:$0xff] }
 0x21c   : > { %v1268_v60 = vsel %vm1267_vm8, %v1647_v53, %v1264_v37  ;;  %v1326_v36 = vmul.f32 %v1303_v11, %v2586_v6  ;;  %v1318_v53 = vsel %vm1315_vm11, %v1317_v0, %v1313_v61  ;;  %v1211_v21 = vand.u32 2147483648, %v2666_v47  ;;  %v1502_v37 = vld [vmem:[%s2804_s6] sm:$0xff] }
 0x21d   : > { %v1273_v28 = vsel %vm2656_vm13, %v1272_v26, %v1268_v60  ;;  %v1283_v19 = vsel %vm1282_vm10, %v1649_v7, %v1279_v9  ;;  %v1327_v23 = vmul.f32 %v1318_v53, %v2588_v1  ;;  %vm2713_vm13 = vmor %vm1235_vm1, %vm1236_vm15  ;;  %v1256_v1 = vand.u32 2147483648, %v2610_v15 }
 0x21e   : > { %v1655_v34 = vpop.eup %1654  ;;  %v1324_v58 = vmul.f32 %v1273_v28, %v2590_v41  ;;  %v1288_v30 = vsel %vm2678_vm6, %v1287_v4, %v1283_v19  ;;  %v1238_v51 = vsel %vm2713_vm13, %v2626_v5, %v1234_v39  ;;  %vm2734_vm15 = vmor %vm1250_vm4, %vm1251_vm12  ;;  %v1209_v13 = vand.u32 2147483647, %v2666_v47  ;;  %v1344_v4 = vpop.permute.xlu2 %1343  ;;  %v1662_v28 = vld [vmem:[%s1853_s25 + $0x10] sm:$0xff]  ;;  %v1663_v19 = vld [vmem:[%s1853_s25 + $0x18] sm:$0xff] }
 0x21f   : > { %v1657_v45 = vpop.eup %1656  ;;  %v1325_v6 = vmul.f32 %v1288_v30, %v2592_v35  ;;  %v1201_v27 = vmul.f32 %v1655_v34, %v2666_v47  ;;  %vm1206_vm0 = vweird.f32 %v1655_v34  ;;  %v1226_v52 = vand.u32 2147483648, %v2668_v38 }
 0x220   : > { %v1332_v26 = vpack.c.bf16 %v1326_v36, %v1324_v58  ;;  %v1216_v41 = vmul.f32 %v1657_v45, %v2668_v38  ;;  %v1253_v5 = vsel %vm2734_vm15, %v2629_v25, %v1249_v55  ;;  %vm1221_vm1 = vweird.f32 %v1657_v45 }
 0x221   : > { %v1202_v7 = vsub.f32 1.0, %v1201_v27  ;;  %v1333_v12 = vpack.c.bf16 %v1327_v23, %v1325_v6  ;;  %v1224_v44 = vand.u32 2147483647, %v2668_v38  ;;  %vm1255_vm2 = vcmp.eq.f32.partialorder %v1254_v24, 8.507059e+37 }
 0x222   : > { %1361 = vmatpush.bf16.msra.mxu2 %v1332_v26  ;;  %v1217_v33 = vsub.f32 1.0, %v1216_v41  ;;  %v1257_v48 = vor.u32 1.1754944e-38, %v1256_v1  ;;  %vm1205_vm3 = vweird.f32 %v2666_v47  ;;  %v1243_v31 = vsel %vm2719_vm14, %v1242_v43, %v1238_v51 }
 0x223   : > { %v1203_v49 = vmul.f32 %v1655_v34, %v1202_v7  ;;  %1375 = vmatpush.bf16.msra.mxu3 %v1333_v12  ;;  %vm1207_vm4 = vmor %vm1205_vm3, %vm1206_vm0  ;;  %v1212_v54 = vor.u32 1.1754944e-38, %v1211_v21  ;;  %vm1220_vm5 = vweird.f32 %v2668_v38  ;;  %vm1210_vm6 = vcmp.eq.f32.partialorder %v1209_v13, 8.507059e+37 }
 0x224   : > { %v1218_v16 = vmul.f32 %v1657_v45, %v1217_v33  ;;  %v1258_v25 = vsel %vm1255_vm2, %v1257_v48, %v1253_v5  ;;  %vm1222_vm7 = vmor %vm1220_vm5, %vm1221_vm1  ;;  %v1227_v40 = vor.u32 1.1754944e-38, %v1226_v52  ;;  %vm1225_vm8 = vcmp.eq.f32.partialorder %v1224_v44, 8.507059e+37 }
 0x225   : > { %v1204_v32 = vadd.f32 %v1655_v34, %v1203_v49  ;;  %v1322_v24 = vmul.f32 %v1243_v31, %v2582_v42  ;;  %v1323_v3 = vmul.f32 %v1258_v25, %v2584_v62  ;;  %vm1351_vm10 = vcmask 261120   ;;  %v1339_v42 = vpop.permute.xlu1 %1338 }
 0x226   : > { %v1219_v50 = vadd.f32 %v1657_v45, %v1218_v16 }
 0x227   : > { %v1208_v56 = vsel %vm1207_vm4, %v1655_v34, %v1204_v32 }
 0x228   : > { %v1213_v46 = vsel %vm1210_vm6, %v1212_v54, %v1208_v56  ;;  %v1223_v15 = vsel %vm1222_vm7, %v1657_v45, %v1219_v50 }
 0x229   : > { %v1320_v47 = vmul.f32 %v1213_v46, %v2604_v29  ;;  %v1228_v59 = vsel %vm1225_vm8, %v1227_v40, %v1223_v15 }
 0x22a   : > { %v1321_v63 = vmul.f32 %v1228_v59, %v2606_v20 }
 0x22b   : > { %v1330_v38 = vpack.c.bf16 %v1322_v24, %v1320_v47 }
 0x22c   : > { %v1331_v2 = vpack.c.bf16 %v1323_v3, %v1321_v63 }
 0x22d   : > { %1362 = vmatpush.bf16.msra.mxu2 %v1330_v38 }
 0x22e   : > { %1376 = vmatpush.bf16.msra.mxu3 %v1331_v2 }
 0x230   : > { %1492 = vmatmul.msk.bf16.vlgmr.msra.gmra.mxu2 %vm1351_vm10, %v1502_v37 }
 0x231   : > { %1493 = vmatmul.msk.bf16.vlgmr.msra.gmra.mxu3 %vm1351_vm10, %v1502_v37 }
 0x2b3   : > { %v1364_v62 = vpop.f32.mrf.mxu2 }
 0x2b4   : > { %v1365_v29 = vadd.f32 %v1364_v62, %v1339_v42  ;;  %v1378_v20 = vpop.f32.mrf.mxu3 }
 0x2b5   : > { %v1379_v8 = vadd.f32 %v1378_v20, %v1339_v42 }
 0x2b6   : > { %v1383_v18 = vadd.f32 %v1660_v17, %v1365_v29 }
 0x2b7   : > { %v1384_v9 = vadd.f32 %v1661_v57, %v1379_v8 }
 0x2b8   : > { %1387 = vst [vmem:[%s298_s21] sm:$0xff] %v1383_v18 }
 0x2b9   : > { %1388 = vst [vmem:[%s298_s21 + $0x8] sm:$0xff] %v1384_v9 }
 0x2bb   : > { %v1366_v39 = vpop.f32.mrf.mxu2 }
 0x2bc   : > { %v1367_v60 = vadd.f32 %v1366_v39, %v1344_v4  ;;  %v1380_v11 = vpop.f32.mrf.mxu3 }
 0x2bd   : > { %v1381_v14 = vadd.f32 %v1380_v11, %v1344_v4 }
 0x2be   : > { %v1385_v36 = vadd.f32 %v1662_v28, %v1367_v60 }
 0x2bf   : > { %v1386_v0 = vadd.f32 %v1663_v19, %v1381_v14 }
 0x2c0   : > { %1389 = vst [vmem:[%s298_s21 + $0x10] sm:$0xff] %v1385_v36 }
 0x2c1   : > { %1390 = vst [vmem:[%s298_s21 + $0x18] sm:$0xff] %v1386_v0 }
 0x2c2   : > { %1691 = shalt.err (!%p1688_p3)
}
 0x2c3   : > { %s1745_s25 = smov 256  }
 0x2c4   : > { %1504 = dma.vmem_to_hbm [thread:$0]  (%p1829_p5), %s1405_s26, 512, %s1407_s10, %s1392_s9, %s1745_s25, %s1745_s25, %s1735_s17  }
 0x2c5 PF: > { %p1510_p4 = scmp.ge.s32.totalorder %s1726_s30, 2  ;;  %s1421_s18 = sand.u32 1, %s1714_s27  }
 0x2c6   : > { %s1422_s21 = scalar_lea.sflag [#allocation3], %s1421_s18 }
 0x2c7   : > { %p1507_p7 = pnand %p1510_p4, %p1833_p6 }
 0x2c9   : > { %p1508_p8 = pneg %p1507_p7 }
 0x2cb   : > { %1709 = dma.done.wait (%p1508_p8), %s1422_s21, 512  }
 0x2cc   : > { %1711 = vsyncadd (%p1508_p8), %s1422_s21, 4294966784  ;;  %p18_p9 = scmp.ge.s32.totalorder %s1816_s11, 4   ;;  %s2834_s27 = smov %s1718_s28 }
 0x2cd   : > { %s2835_s28 = smov %s1722_s29  ;;  %s2836_s29 = smov %s1827_s14 }
 0x2ce   : > { %s2837_s30 = smov %s1816_s11  ;;  %20 = sbr.rel (!%p18_p9) target bundleno = 3 (0x3), region = 87 }
 0x2d3   :  { %1428 = vsyncpa [#allocation3], 1 }
 0x2d4   :  { %1430 = vsyncpa [#allocation3 + $0x1], 1 }

</bundles_post_ra>
